<compile_context>
chip_gen: v7x
topology: tpu7x:2x2x1
jax: 0.10.0
libtpu: 0.0.40
codegen_flags: <defaults>
</compile_context>

<pallas_src>
import functools

import jax
import jax.numpy as jnp
from jax.experimental import pallas as pl
from jax.experimental.pallas import tpu as pltpu


# ----------------------------------------------------------------------------
# Pallas kernel: whole GRU encoder in one invocation.
#   idx_ref  : (T*Bp, 1) int32   time-major flattened grapheme indices
#   gtab_ref : (Vp, 3H)  f32     fused table: enc_emb @ W_ih^T + b_ih + [b_hr, b_hz, 0]
#   whh_ref  : (H, 3H)   f32     W_hh^T   (PyTorch fused gate order [r, z, n])
#   bhn_ref  : (1, H)    f32     hidden bias of the n gate (must stay inside r*(...))
#   out_ref  : (T, Bp, H) f32    time-major encoder outputs
#   gi_ref   : (T*Bp, 3H) f32    VMEM scratch for precomputed input gates
# ----------------------------------------------------------------------------
def _gru_encoder_kernel(idx_ref, gtab_ref, whh_ref, bhn_ref, out_ref, gi_ref):
    T, Bp, H = out_ref.shape
    TB = T * Bp
    Vp = gtab_ref.shape[0]

    # --- In-kernel embedding gather + input projection (one MXU matmul, off the
    #     serial path): one-hot rows select rows of the fused (Vp, 3H) gate table.
    iota_v = jax.lax.broadcasted_iota(jnp.int32, (TB, Vp), 1)
    onehot = (idx_ref[...] == iota_v).astype(jnp.float32)          # (TB, Vp)
    gi_ref[...] = jnp.dot(onehot, gtab_ref[...],
                          preferred_element_type=jnp.float32)      # (TB, 3H)

    # --- Hoisted weight / bias loads (loop-invariant).
    whh = whh_ref[...]
    whh_r = whh[:, 0 * H:1 * H]
    whh_z = whh[:, 1 * H:2 * H]
    whh_n = whh[:, 2 * H:3 * H]
    bhn = jnp.broadcast_to(bhn_ref[...], (Bp, H))                  # one-time broadcast

    # --- Serial recurrence over time.
    def step(t, h):
        start = pl.multiple_of(t * Bp, Bp)                         # Bp is a multiple of 8
        gi = gi_ref[pl.ds(start, Bp), :]                           # (Bp, 3H), biases folded
        # Three (H, H) dots in r, z, n order so r/z EUP work overlaps the n drain.
        gh_r = jnp.dot(h, whh_r, preferred_element_type=jnp.float32)
        gh_z = jnp.dot(h, whh_z, preferred_element_type=jnp.float32)
        gh_n = jnp.dot(h, whh_n, preferred_element_type=jnp.float32)
        r = jax.nn.sigmoid(gi[:, 0 * H:1 * H] + gh_r)
        z = jax.nn.sigmoid(gi[:, 1 * H:2 * H] + gh_z)
        n = jnp.tanh(gi[:, 2 * H:3 * H] + r * (gh_n + bhn))
        h_new = (1.0 - z) * n + z * h
        out_ref[t] = h_new                                         # dense (Bp, H) store
        return h_new

    jax.lax.fori_loop(0, T, step, jnp.zeros((Bp, H), jnp.float32), unroll=True)


def gru_encoder_pallas(idx_tb, gate_table, whh_t, bhn, *, T, Bp, H):
    """Single-layer GRU encoder.

    Args:
      idx_tb:     (T*Bp, 1) int32 time-major flattened grapheme indices.
      gate_table: (Vp, 3H)  f32 fused enc_emb/W_ih/bias table.
      whh_t:      (H, 3H)   f32 W_hh^T.
      bhn:        (1, H)    f32 hidden bias of the n gate.
    Returns:
      encoder outputs, time-major (T, Bp, H).
    """
    Vp = gate_table.shape[0]
    return pl.pallas_call(
        _gru_encoder_kernel,
        out_shape=jax.ShapeDtypeStruct((T, Bp, H), jnp.float32),
        grid_spec=pltpu.PrefetchScalarGridSpec(
            num_scalar_prefetch=0,
            grid=(1,),                                             # single invocation
            in_specs=[
                pl.BlockSpec((T * Bp, 1), lambda i: (0, 0)),       # indices
                pl.BlockSpec((Vp, 3 * H), lambda i: (0, 0)),       # fused gate table
                pl.BlockSpec((H, 3 * H), lambda i: (0, 0)),        # W_hh^T
                pl.BlockSpec((1, H), lambda i: (0, 0)),            # b_hn
            ],
            out_specs=pl.BlockSpec((T, Bp, H), lambda i: (0, 0, 0)),
            scratch_shapes=[pltpu.VMEM((T * Bp, 3 * H), jnp.float32)],
        ),
        compiler_params=pltpu.CompilerParams(
            dimension_semantics=("arbitrary",),
        ),
    )(idx_tb, gate_table, whh_t, bhn)


# ----------------------------------------------------------------------------
# G2P forward: index prep + fused weight prep (wrapper) + Pallas GRU encoder.
# ----------------------------------------------------------------------------
def g2p_forward(x_idx, params):
    """x_idx: (B, T) int32 grapheme indices.

    Returns:
      encoder_outputs: (B, T, H)  batch-first
      hidden:          (1, B, H)  final hidden state (PyTorch GRU convention)
    """
    B, T = x_idx.shape
    Bp = max(8, ((B + 7) // 8) * 8)                      # sublane-align batch
    V, _E = params["enc_emb"].shape
    H = params["w_hh"].shape[1]
    Vp = ((V + 7) // 8) * 8

    # Pad the tiny index matrix (<pad>=0) and flatten time-major (t major, b minor).
    x_pad = jnp.pad(x_idx.astype(jnp.int32), ((0, Bp - B), (0, 0)))   # (Bp, T)
    idx_tb = x_pad.T.reshape(T * Bp, 1)

    # Fused input path (pure weight prep, input-independent, exact):
    #   gi[t,b] = W_ih @ enc_emb[x[t,b]] + b_ih (+ b_hr, b_hz)
    #           = gate_table[x[t,b]]
    b_hh = params["b_hh"]
    bias_rz = jnp.concatenate([b_hh[:2 * H], jnp.zeros((H,), jnp.float32)])
    gate_table = (
        jnp.dot(params["enc_emb"], params["w_ih"].T,
                precision=jax.lax.Precision.HIGHEST)
        + params["b_ih"] + bias_rz
    )
    gate_table = jnp.pad(gate_table, ((0, Vp - V), (0, 0)))           # (Vp, 3H)

    whh_t = jnp.transpose(params["w_hh"])                # (H, 3H)
    bhn = b_hh[2 * H:].reshape(1, H)                     # only the n-gate hidden bias
    # dropout == identity (eval mode)

    out_tbh = gru_encoder_pallas(idx_tb, gate_table, whh_t, bhn,
                                 T=T, Bp=Bp, H=H)        # (T, Bp, H) time-major

    encoder_outputs = jnp.transpose(out_tbh[:, :B, :], (1, 0, 2))     # (B, T, H)
    hidden = out_tbh[-1, :B, :][None, :, :]                           # (1, B, H) == h_n
    return encoder_outputs, hidden


# ----------------------------------------------------------------------------
# Pure-JAX reference GRU (lax.scan) for correctness checking.
# ----------------------------------------------------------------------------
def gru_encoder_ref(emb_tbe, w_ih, w_hh, b_ih, b_hh):
    H = w_hh.shape[1]

    def step(h, x_t):
        gi = x_t @ w_ih.T + b_ih
        gh = h @ w_hh.T + b_hh
        r = jax.nn.sigmoid(gi[:, :H] + gh[:, :H])
        z = jax.nn.sigmoid(gi[:, H:2 * H] + gh[:, H:2 * H])
        n = jnp.tanh(gi[:, 2 * H:] + r * gh[:, 2 * H:])
        h_new = (1.0 - z) * n + z * h
        return h_new, h_new

    h0 = jnp.zeros((emb_tbe.shape[1], H), jnp.float32)
    h_n, outs = jax.lax.scan(step, h0, emb_tbe)
    return outs, h_n


# ----------------------------------------------------------------------------
# Deterministic parameter initialization (synthetic weights, no checkpoint).
# ----------------------------------------------------------------------------
def init_params(key, num_graphemes, embedding_dim, hidden_size):
    ks = jax.random.split(key, 5)
    scale = 1.0 / jnp.sqrt(hidden_size)
    return {
        "enc_emb": jax.random.normal(ks[0], (num_graphemes, embedding_dim), jnp.float32) * 0.1,
        "w_ih": jax.random.uniform(ks[1], (3 * hidden_size, embedding_dim), jnp.float32,
                                   -scale, scale),
        "w_hh": jax.random.uniform(ks[2], (3 * hidden_size, hidden_size), jnp.float32,
                                   -scale, scale),
        "b_ih": jax.random.uniform(ks[3], (3 * hidden_size,), jnp.float32, -scale, scale),
        "b_hh": jax.random.uniform(ks[4], (3 * hidden_size,), jnp.float32, -scale, scale),
    }


if __name__ == "__main__":
    # Small shapes consistent with the module's forward (indices -> emb -> GRU).
    # (Module defaults are embedding_dim=hidden_size=500; scaled down to 128 to
    #  stay lane-aligned and small for the test.)
    NUM_GRAPHEMES = 29           # '<pad>', '<unk>', '</s>' + 26 letters
    EMB_DIM = 128
    HIDDEN = 128
    B, T = 2, 8

    key = jax.random.PRNGKey(0)
    k_par, k_x = jax.random.split(key)
    params = init_params(k_par, NUM_GRAPHEMES, EMB_DIM, HIDDEN)
    x = jax.random.randint(k_x, (B, T), 0, NUM_GRAPHEMES, dtype=jnp.int32)

    enc_out, hidden = jax.jit(functools.partial(g2p_forward, params=params))(x)
    jax.block_until_ready((enc_out, hidden))

    # Cross-check against pure-JAX reference GRU (unpadded batch).
    emb_tbe_ref = jnp.transpose(params["enc_emb"][x], (1, 0, 2))
    ref_out_tbh, ref_hn = gru_encoder_ref(emb_tbe_ref, params["w_ih"], params["w_hh"],
                                          params["b_ih"], params["b_hh"])
    ref_out = jnp.transpose(ref_out_tbh, (1, 0, 2))

    assert enc_out.shape == (B, T, HIDDEN)
    assert hidden.shape == (1, B, HIDDEN)
    assert jnp.allclose(enc_out, ref_out, atol=2e-5, rtol=2e-5)
    assert jnp.allclose(hidden[0], ref_hn, atol=2e-5, rtol=2e-5)

    print("KERNEL_OK")
</pallas_src>

<mosaic_0001>
module attributes {stable_mosaic.version = 11 : i64} {
  func.func @_gru_encoder_kernel(%arg0: i32, %arg1: memref<64x1xi32, #tpu.memory_space<vmem>>, %arg2: memref<32x384xf32, #tpu.memory_space<vmem>>, %arg3: memref<128x384xf32, #tpu.memory_space<vmem>>, %arg4: memref<1x128xf32, #tpu.memory_space<vmem>>, %arg5: memref<8x8x128xf32, #tpu.memory_space<vmem>>, %arg6: memref<64x384xf32, #tpu.memory_space<vmem>>) attributes {dimension_semantics = [#tpu.dimension_semantics<arbitrary>], iteration_bounds = array<i64: 1>, scalar_prefetch = 0 : i64, scratch_operands = 1 : i64, tpu.core_type = #tpu.core_type<tc>, window_params = [{pipeline_mode = #tpu.pipeline_mode<synchronous>, transform_indices = @transform_0, window_bounds = array<i64: 64, 1>}, {pipeline_mode = #tpu.pipeline_mode<synchronous>, transform_indices = @transform_1, window_bounds = array<i64: 32, 384>}, {pipeline_mode = #tpu.pipeline_mode<synchronous>, transform_indices = @transform_2, window_bounds = array<i64: 128, 384>}, {pipeline_mode = #tpu.pipeline_mode<synchronous>, transform_indices = @transform_3, window_bounds = array<i64: 1, 128>}, {pipeline_mode = #tpu.pipeline_mode<synchronous>, transform_indices = @transform_4, window_bounds = array<i64: 8, 8, 128>}]} {
    %0 = tpu.iota {dimensions = array<i32: 1>} : vector<64x32xi32>
    %c0 = arith.constant 0 : index
    %c0_0 = arith.constant 0 : index
    %1 = vector.load %arg1[%c0, %c0_0] : memref<64x1xi32, #tpu.memory_space<vmem>>, vector<64x1xi32>
    %2 = vector.broadcast %1 : vector<64x1xi32> to vector<64x32xi32>
    %3 = arith.cmpi eq, %2, %0 : vector<64x32xi32>
    %4 = arith.extui %3 : vector<64x32xi1> to vector<64x32xi32>
    %5 = arith.sitofp %4 : vector<64x32xi32> to vector<64x32xf32>
    %c0_1 = arith.constant 0 : index
    %c0_2 = arith.constant 0 : index
    %6 = vector.load %arg2[%c0_1, %c0_2] : memref<32x384xf32, #tpu.memory_space<vmem>>, vector<32x384xf32>
    %cst = arith.constant dense<0.000000e+00> : vector<64x384xf32>
    %7 = tpu.matmul %5, %6, %cst {dimension_numbers = #tpu.dot_dimension_numbers<[1], [0], [0], [1], [0, 0, 1, 1], [], []>} : vector<64x32xf32>, vector<32x384xf32>, vector<64x384xf32> -> vector<64x384xf32>
    %c0_3 = arith.constant 0 : index
    %c0_4 = arith.constant 0 : index
    %8 = vector.load %arg6[%c0_3, %c0_4] : memref<64x384xf32, #tpu.memory_space<vmem>>, vector<64x384xf32>
    tpu.vector_store %arg6[%c0_3, %c0_4], %7 {strides = array<i32>} : memref<64x384xf32, #tpu.memory_space<vmem>>, vector<64x384xf32>,
    %c0_5 = arith.constant 0 : index
    %c0_6 = arith.constant 0 : index
    %9 = vector.load %arg3[%c0_5, %c0_6] : memref<128x384xf32, #tpu.memory_space<vmem>>, vector<128x384xf32>
    %10 = vector.extract_strided_slice %9 {offsets = [0, 0], sizes = [128, 128], strides = [1, 1]} : vector<128x384xf32> to vector<128x128xf32>
    %11 = vector.extract_strided_slice %9 {offsets = [0, 128], sizes = [128, 128], strides = [1, 1]} : vector<128x384xf32> to vector<128x128xf32>
    %12 = vector.extract_strided_slice %9 {offsets = [0, 256], sizes = [128, 128], strides = [1, 1]} : vector<128x384xf32> to vector<128x128xf32>
    %c0_7 = arith.constant 0 : index
    %c0_8 = arith.constant 0 : index
    %13 = vector.load %arg4[%c0_7, %c0_8] : memref<1x128xf32, #tpu.memory_space<vmem>>, vector<1x128xf32>
    %14 = vector.shape_cast %13 : vector<1x128xf32> to vector<1x128xf32>
    %15 = vector.broadcast %14 : vector<1x128xf32> to vector<8x128xf32>
    %cst_9 = arith.constant 0.000000e+00 : f32
    %16 = vector.broadcast %cst_9 : f32 to vector<8x128xf32>
    %c0_i32 = arith.constant 0 : i32
    %c8_i32 = arith.constant 8 : i32
    %17 = arith.muli %c0_i32, %c8_i32 : i32
    %18 = tpu.assume_multiple %17, 8 : i32
    %19 = arith.index_cast %18 : i32 to index
    %c0_10 = arith.constant 0 : index
    %20 = vector.load %arg6[%19, %c0_10] : memref<64x384xf32, #tpu.memory_space<vmem>>, vector<8x384xf32>
    %cst_11 = arith.constant dense<0.000000e+00> : vector<8x128xf32>
    %21 = tpu.matmul %16, %10, %cst_11 {dimension_numbers = #tpu.dot_dimension_numbers<[1], [0], [0], [1], [0, 0, 1, 1], [], []>} : vector<8x128xf32>, vector<128x128xf32>, vector<8x128xf32> -> vector<8x128xf32>
    %cst_12 = arith.constant dense<0.000000e+00> : vector<8x128xf32>
    %22 = tpu.matmul %16, %11, %cst_12 {dimension_numbers = #tpu.dot_dimension_numbers<[1], [0], [0], [1], [0, 0, 1, 1], [], []>} : vector<8x128xf32>, vector<128x128xf32>, vector<8x128xf32> -> vector<8x128xf32>
    %cst_13 = arith.constant dense<0.000000e+00> : vector<8x128xf32>
    %23 = tpu.matmul %16, %12, %cst_13 {dimension_numbers = #tpu.dot_dimension_numbers<[1], [0], [0], [1], [0, 0, 1, 1], [], []>} : vector<8x128xf32>, vector<128x128xf32>, vector<8x128xf32> -> vector<8x128xf32>
    %24 = vector.extract_strided_slice %20 {offsets = [0, 0], sizes = [8, 128], strides = [1, 1]} : vector<8x384xf32> to vector<8x128xf32>
    %25 = arith.addf %24, %21 : vector<8x128xf32>
    %26 = arith.negf %25 : vector<8x128xf32>
    %27 = math.exp %26 : vector<8x128xf32>
    %cst_14 = arith.constant 1.000000e+00 : f32
    %28 = vector.broadcast %cst_14 : f32 to vector<8x128xf32>
    %29 = arith.addf %28, %27 : vector<8x128xf32>
    %30 = arith.divf %28, %29 : vector<8x128xf32>
    %31 = vector.extract_strided_slice %20 {offsets = [0, 128], sizes = [8, 128], strides = [1, 1]} : vector<8x384xf32> to vector<8x128xf32>
    %32 = arith.addf %31, %22 : vector<8x128xf32>
    %33 = arith.negf %32 : vector<8x128xf32>
    %34 = math.exp %33 : vector<8x128xf32>
    %cst_15 = arith.constant 1.000000e+00 : f32
    %35 = vector.broadcast %cst_15 : f32 to vector<8x128xf32>
    %36 = arith.addf %35, %34 : vector<8x128xf32>
    %37 = arith.divf %35, %36 : vector<8x128xf32>
    %38 = vector.extract_strided_slice %20 {offsets = [0, 256], sizes = [8, 128], strides = [1, 1]} : vector<8x384xf32> to vector<8x128xf32>
    %39 = arith.addf %23, %15 : vector<8x128xf32>
    %40 = arith.mulf %30, %39 : vector<8x128xf32>
    %41 = arith.addf %38, %40 : vector<8x128xf32>
    %42 = math.tanh %41 : vector<8x128xf32>
    %cst_16 = arith.constant 1.000000e+00 : f32
    %43 = vector.broadcast %cst_16 : f32 to vector<8x128xf32>
    %44 = arith.subf %43, %37 : vector<8x128xf32>
    %45 = arith.mulf %44, %42 : vector<8x128xf32>
    %46 = arith.mulf %37, %16 : vector<8x128xf32>
    %47 = arith.addf %45, %46 : vector<8x128xf32>
    %48 = arith.index_cast %c0_i32 : i32 to index
    %c0_17 = arith.constant 0 : index
    %c0_18 = arith.constant 0 : index
    %49 = vector.load %arg5[%48, %c0_17, %c0_18] : memref<8x8x128xf32, #tpu.memory_space<vmem>>, vector<1x8x128xf32>
    %50 = vector.shape_cast %49 : vector<1x8x128xf32> to vector<8x128xf32>
    %51 = vector.shape_cast %47 : vector<8x128xf32> to vector<1x8x128xf32>
    tpu.vector_store %arg5[%48, %c0_17, %c0_18], %51 {strides = array<i32>} : memref<8x8x128xf32, #tpu.memory_space<vmem>>, vector<1x8x128xf32>,
    %c1_i32 = arith.constant 1 : i32
    %c8_i32_19 = arith.constant 8 : i32
    %52 = arith.muli %c1_i32, %c8_i32_19 : i32
    %53 = tpu.assume_multiple %52, 8 : i32
    %54 = arith.index_cast %53 : i32 to index
    %c0_20 = arith.constant 0 : index
    %55 = vector.load %arg6[%54, %c0_20] : memref<64x384xf32, #tpu.memory_space<vmem>>, vector<8x384xf32>
    %cst_21 = arith.constant dense<0.000000e+00> : vector<8x128xf32>
    %56 = tpu.matmul %47, %10, %cst_21 {dimension_numbers = #tpu.dot_dimension_numbers<[1], [0], [0], [1], [0, 0, 1, 1], [], []>} : vector<8x128xf32>, vector<128x128xf32>, vector<8x128xf32> -> vector<8x128xf32>
    %cst_22 = arith.constant dense<0.000000e+00> : vector<8x128xf32>
    %57 = tpu.matmul %47, %11, %cst_22 {dimension_numbers = #tpu.dot_dimension_numbers<[1], [0], [0], [1], [0, 0, 1, 1], [], []>} : vector<8x128xf32>, vector<128x128xf32>, vector<8x128xf32> -> vector<8x128xf32>
    %cst_23 = arith.constant dense<0.000000e+00> : vector<8x128xf32>
    %58 = tpu.matmul %47, %12, %cst_23 {dimension_numbers = #tpu.dot_dimension_numbers<[1], [0], [0], [1], [0, 0, 1, 1], [], []>} : vector<8x128xf32>, vector<128x128xf32>, vector<8x128xf32> -> vector<8x128xf32>
    %59 = vector.extract_strided_slice %55 {offsets = [0, 0], sizes = [8, 128], strides = [1, 1]} : vector<8x384xf32> to vector<8x128xf32>
    %60 = arith.addf %59, %56 : vector<8x128xf32>
    %61 = arith.negf %60 : vector<8x128xf32>
    %62 = math.exp %61 : vector<8x128xf32>
    %cst_24 = arith.constant 1.000000e+00 : f32
    %63 = vector.broadcast %cst_24 : f32 to vector<8x128xf32>
    %64 = arith.addf %63, %62 : vector<8x128xf32>
    %65 = arith.divf %63, %64 : vector<8x128xf32>
    %66 = vector.extract_strided_slice %55 {offsets = [0, 128], sizes = [8, 128], strides = [1, 1]} : vector<8x384xf32> to vector<8x128xf32>
    %67 = arith.addf %66, %57 : vector<8x128xf32>
    %68 = arith.negf %67 : vector<8x128xf32>
    %69 = math.exp %68 : vector<8x128xf32>
    %cst_25 = arith.constant 1.000000e+00 : f32
    %70 = vector.broadcast %cst_25 : f32 to vector<8x128xf32>
    %71 = arith.addf %70, %69 : vector<8x128xf32>
    %72 = arith.divf %70, %71 : vector<8x128xf32>
    %73 = vector.extract_strided_slice %55 {offsets = [0, 256], sizes = [8, 128], strides = [1, 1]} : vector<8x384xf32> to vector<8x128xf32>
    %74 = arith.addf %58, %15 : vector<8x128xf32>
    %75 = arith.mulf %65, %74 : vector<8x128xf32>
    %76 = arith.addf %73, %75 : vector<8x128xf32>
    %77 = math.tanh %76 : vector<8x128xf32>
    %cst_26 = arith.constant 1.000000e+00 : f32
    %78 = vector.broadcast %cst_26 : f32 to vector<8x128xf32>
    %79 = arith.subf %78, %72 : vector<8x128xf32>
    %80 = arith.mulf %79, %77 : vector<8x128xf32>
    %81 = arith.mulf %72, %47 : vector<8x128xf32>
    %82 = arith.addf %80, %81 : vector<8x128xf32>
    %83 = arith.index_cast %c1_i32 : i32 to index
    %c0_27 = arith.constant 0 : index
    %c0_28 = arith.constant 0 : index
    %84 = vector.load %arg5[%83, %c0_27, %c0_28] : memref<8x8x128xf32, #tpu.memory_space<vmem>>, vector<1x8x128xf32>
    %85 = vector.shape_cast %84 : vector<1x8x128xf32> to vector<8x128xf32>
    %86 = vector.shape_cast %82 : vector<8x128xf32> to vector<1x8x128xf32>
    tpu.vector_store %arg5[%83, %c0_27, %c0_28], %86 {strides = array<i32>} : memref<8x8x128xf32, #tpu.memory_space<vmem>>, vector<1x8x128xf32>,
    %c2_i32 = arith.constant 2 : i32
    %c8_i32_29 = arith.constant 8 : i32
    %87 = arith.muli %c2_i32, %c8_i32_29 : i32
    %88 = tpu.assume_multiple %87, 8 : i32
    %89 = arith.index_cast %88 : i32 to index
    %c0_30 = arith.constant 0 : index
    %90 = vector.load %arg6[%89, %c0_30] : memref<64x384xf32, #tpu.memory_space<vmem>>, vector<8x384xf32>
    %cst_31 = arith.constant dense<0.000000e+00> : vector<8x128xf32>
    %91 = tpu.matmul %82, %10, %cst_31 {dimension_numbers = #tpu.dot_dimension_numbers<[1], [0], [0], [1], [0, 0, 1, 1], [], []>} : vector<8x128xf32>, vector<128x128xf32>, vector<8x128xf32> -> vector<8x128xf32>
    %cst_32 = arith.constant dense<0.000000e+00> : vector<8x128xf32>
    %92 = tpu.matmul %82, %11, %cst_32 {dimension_numbers = #tpu.dot_dimension_numbers<[1], [0], [0], [1], [0, 0, 1, 1], [], []>} : vector<8x128xf32>, vector<128x128xf32>, vector<8x128xf32> -> vector<8x128xf32>
    %cst_33 = arith.constant dense<0.000000e+00> : vector<8x128xf32>
    %93 = tpu.matmul %82, %12, %cst_33 {dimension_numbers = #tpu.dot_dimension_numbers<[1], [0], [0], [1], [0, 0, 1, 1], [], []>} : vector<8x128xf32>, vector<128x128xf32>, vector<8x128xf32> -> vector<8x128xf32>
    %94 = vector.extract_strided_slice %90 {offsets = [0, 0], sizes = [8, 128], strides = [1, 1]} : vector<8x384xf32> to vector<8x128xf32>
    %95 = arith.addf %94, %91 : vector<8x128xf32>
    %96 = arith.negf %95 : vector<8x128xf32>
    %97 = math.exp %96 : vector<8x128xf32>
    %cst_34 = arith.constant 1.000000e+00 : f32
    %98 = vector.broadcast %cst_34 : f32 to vector<8x128xf32>
    %99 = arith.addf %98, %97 : vector<8x128xf32>
    %100 = arith.divf %98, %99 : vector<8x128xf32>
    %101 = vector.extract_strided_slice %90 {offsets = [0, 128], sizes = [8, 128], strides = [1, 1]} : vector<8x384xf32> to vector<8x128xf32>
    %102 = arith.addf %101, %92 : vector<8x128xf32>
    %103 = arith.negf %102 : vector<8x128xf32>
    %104 = math.exp %103 : vector<8x128xf32>
    %cst_35 = arith.constant 1.000000e+00 : f32
    %105 = vector.broadcast %cst_35 : f32 to vector<8x128xf32>
    %106 = arith.addf %105, %104 : vector<8x128xf32>
    %107 = arith.divf %105, %106 : vector<8x128xf32>
    %108 = vector.extract_strided_slice %90 {offsets = [0, 256], sizes = [8, 128], strides = [1, 1]} : vector<8x384xf32> to vector<8x128xf32>
    %109 = arith.addf %93, %15 : vector<8x128xf32>
    %110 = arith.mulf %100, %109 : vector<8x128xf32>
    %111 = arith.addf %108, %110 : vector<8x128xf32>
    %112 = math.tanh %111 : vector<8x128xf32>
    %cst_36 = arith.constant 1.000000e+00 : f32
    %113 = vector.broadcast %cst_36 : f32 to vector<8x128xf32>
    %114 = arith.subf %113, %107 : vector<8x128xf32>
    %115 = arith.mulf %114, %112 : vector<8x128xf32>
    %116 = arith.mulf %107, %82 : vector<8x128xf32>
    %117 = arith.addf %115, %116 : vector<8x128xf32>
    %118 = arith.index_cast %c2_i32 : i32 to index
    %c0_37 = arith.constant 0 : index
    %c0_38 = arith.constant 0 : index
    %119 = vector.load %arg5[%118, %c0_37, %c0_38] : memref<8x8x128xf32, #tpu.memory_space<vmem>>, vector<1x8x128xf32>
    %120 = vector.shape_cast %119 : vector<1x8x128xf32> to vector<8x128xf32>
    %121 = vector.shape_cast %117 : vector<8x128xf32> to vector<1x8x128xf32>
    tpu.vector_store %arg5[%118, %c0_37, %c0_38], %121 {strides = array<i32>} : memref<8x8x128xf32, #tpu.memory_space<vmem>>, vector<1x8x128xf32>,
    %c3_i32 = arith.constant 3 : i32
    %c8_i32_39 = arith.constant 8 : i32
    %122 = arith.muli %c3_i32, %c8_i32_39 : i32
    %123 = tpu.assume_multiple %122, 8 : i32
    %124 = arith.index_cast %123 : i32 to index
    %c0_40 = arith.constant 0 : index
    %125 = vector.load %arg6[%124, %c0_40] : memref<64x384xf32, #tpu.memory_space<vmem>>, vector<8x384xf32>
    %cst_41 = arith.constant dense<0.000000e+00> : vector<8x128xf32>
    %126 = tpu.matmul %117, %10, %cst_41 {dimension_numbers = #tpu.dot_dimension_numbers<[1], [0], [0], [1], [0, 0, 1, 1], [], []>} : vector<8x128xf32>, vector<128x128xf32>, vector<8x128xf32> -> vector<8x128xf32>
    %cst_42 = arith.constant dense<0.000000e+00> : vector<8x128xf32>
    %127 = tpu.matmul %117, %11, %cst_42 {dimension_numbers = #tpu.dot_dimension_numbers<[1], [0], [0], [1], [0, 0, 1, 1], [], []>} : vector<8x128xf32>, vector<128x128xf32>, vector<8x128xf32> -> vector<8x128xf32>
    %cst_43 = arith.constant dense<0.000000e+00> : vector<8x128xf32>
    %128 = tpu.matmul %117, %12, %cst_43 {dimension_numbers = #tpu.dot_dimension_numbers<[1], [0], [0], [1], [0, 0, 1, 1], [], []>} : vector<8x128xf32>, vector<128x128xf32>, vector<8x128xf32> -> vector<8x128xf32>
    %129 = vector.extract_strided_slice %125 {offsets = [0, 0], sizes = [8, 128], strides = [1, 1]} : vector<8x384xf32> to vector<8x128xf32>
    %130 = arith.addf %129, %126 : vector<8x128xf32>
    %131 = arith.negf %130 : vector<8x128xf32>
    %132 = math.exp %131 : vector<8x128xf32>
    %cst_44 = arith.constant 1.000000e+00 : f32
    %133 = vector.broadcast %cst_44 : f32 to vector<8x128xf32>
    %134 = arith.addf %133, %132 : vector<8x128xf32>
    %135 = arith.divf %133, %134 : vector<8x128xf32>
    %136 = vector.extract_strided_slice %125 {offsets = [0, 128], sizes = [8, 128], strides = [1, 1]} : vector<8x384xf32> to vector<8x128xf32>
    %137 = arith.addf %136, %127 : vector<8x128xf32>
    %138 = arith.negf %137 : vector<8x128xf32>
    %139 = math.exp %138 : vector<8x128xf32>
    %cst_45 = arith.constant 1.000000e+00 : f32
    %140 = vector.broadcast %cst_45 : f32 to vector<8x128xf32>
    %141 = arith.addf %140, %139 : vector<8x128xf32>
    %142 = arith.divf %140, %141 : vector<8x128xf32>
    %143 = vector.extract_strided_slice %125 {offsets = [0, 256], sizes = [8, 128], strides = [1, 1]} : vector<8x384xf32> to vector<8x128xf32>
    %144 = arith.addf %128, %15 : vector<8x128xf32>
    %145 = arith.mulf %135, %144 : vector<8x128xf32>
    %146 = arith.addf %143, %145 : vector<8x128xf32>
    %147 = math.tanh %146 : vector<8x128xf32>
    %cst_46 = arith.constant 1.000000e+00 : f32
    %148 = vector.broadcast %cst_46 : f32 to vector<8x128xf32>
    %149 = arith.subf %148, %142 : vector<8x128xf32>
    %150 = arith.mulf %149, %147 : vector<8x128xf32>
    %151 = arith.mulf %142, %117 : vector<8x128xf32>
    %152 = arith.addf %150, %151 : vector<8x128xf32>
    %153 = arith.index_cast %c3_i32 : i32 to index
    %c0_47 = arith.constant 0 : index
    %c0_48 = arith.constant 0 : index
    %154 = vector.load %arg5[%153, %c0_47, %c0_48] : memref<8x8x128xf32, #tpu.memory_space<vmem>>, vector<1x8x128xf32>
    %155 = vector.shape_cast %154 : vector<1x8x128xf32> to vector<8x128xf32>
    %156 = vector.shape_cast %152 : vector<8x128xf32> to vector<1x8x128xf32>
    tpu.vector_store %arg5[%153, %c0_47, %c0_48], %156 {strides = array<i32>} : memref<8x8x128xf32, #tpu.memory_space<vmem>>, vector<1x8x128xf32>,
    %c4_i32 = arith.constant 4 : i32
    %c8_i32_49 = arith.constant 8 : i32
    %157 = arith.muli %c4_i32, %c8_i32_49 : i32
    %158 = tpu.assume_multiple %157, 8 : i32
    %159 = arith.index_cast %158 : i32 to index
    %c0_50 = arith.constant 0 : index
    %160 = vector.load %arg6[%159, %c0_50] : memref<64x384xf32, #tpu.memory_space<vmem>>, vector<8x384xf32>
    %cst_51 = arith.constant dense<0.000000e+00> : vector<8x128xf32>
    %161 = tpu.matmul %152, %10, %cst_51 {dimension_numbers = #tpu.dot_dimension_numbers<[1], [0], [0], [1], [0, 0, 1, 1], [], []>} : vector<8x128xf32>, vector<128x128xf32>, vector<8x128xf32> -> vector<8x128xf32>
    %cst_52 = arith.constant dense<0.000000e+00> : vector<8x128xf32>
    %162 = tpu.matmul %152, %11, %cst_52 {dimension_numbers = #tpu.dot_dimension_numbers<[1], [0], [0], [1], [0, 0, 1, 1], [], []>} : vector<8x128xf32>, vector<128x128xf32>, vector<8x128xf32> -> vector<8x128xf32>
    %cst_53 = arith.constant dense<0.000000e+00> : vector<8x128xf32>
    %163 = tpu.matmul %152, %12, %cst_53 {dimension_numbers = #tpu.dot_dimension_numbers<[1], [0], [0], [1], [0, 0, 1, 1], [], []>} : vector<8x128xf32>, vector<128x128xf32>, vector<8x128xf32> -> vector<8x128xf32>
    %164 = vector.extract_strided_slice %160 {offsets = [0, 0], sizes = [8, 128], strides = [1, 1]} : vector<8x384xf32> to vector<8x128xf32>
    %165 = arith.addf %164, %161 : vector<8x128xf32>
    %166 = arith.negf %165 : vector<8x128xf32>
    %167 = math.exp %166 : vector<8x128xf32>
    %cst_54 = arith.constant 1.000000e+00 : f32
    %168 = vector.broadcast %cst_54 : f32 to vector<8x128xf32>
    %169 = arith.addf %168, %167 : vector<8x128xf32>
    %170 = arith.divf %168, %169 : vector<8x128xf32>
    %171 = vector.extract_strided_slice %160 {offsets = [0, 128], sizes = [8, 128], strides = [1, 1]} : vector<8x384xf32> to vector<8x128xf32>
    %172 = arith.addf %171, %162 : vector<8x128xf32>
    %173 = arith.negf %172 : vector<8x128xf32>
    %174 = math.exp %173 : vector<8x128xf32>
    %cst_55 = arith.constant 1.000000e+00 : f32
    %175 = vector.broadcast %cst_55 : f32 to vector<8x128xf32>
    %176 = arith.addf %175, %174 : vector<8x128xf32>
    %177 = arith.divf %175, %176 : vector<8x128xf32>
    %178 = vector.extract_strided_slice %160 {offsets = [0, 256], sizes = [8, 128], strides = [1, 1]} : vector<8x384xf32> to vector<8x128xf32>
    %179 = arith.addf %163, %15 : vector<8x128xf32>
    %180 = arith.mulf %170, %179 : vector<8x128xf32>
    %181 = arith.addf %178, %180 : vector<8x128xf32>
    %182 = math.tanh %181 : vector<8x128xf32>
    %cst_56 = arith.constant 1.000000e+00 : f32
    %183 = vector.broadcast %cst_56 : f32 to vector<8x128xf32>
    %184 = arith.subf %183, %177 : vector<8x128xf32>
    %185 = arith.mulf %184, %182 : vector<8x128xf32>
    %186 = arith.mulf %177, %152 : vector<8x128xf32>
    %187 = arith.addf %185, %186 : vector<8x128xf32>
    %188 = arith.index_cast %c4_i32 : i32 to index
    %c0_57 = arith.constant 0 : index
    %c0_58 = arith.constant 0 : index
    %189 = vector.load %arg5[%188, %c0_57, %c0_58] : memref<8x8x128xf32, #tpu.memory_space<vmem>>, vector<1x8x128xf32>
    %190 = vector.shape_cast %189 : vector<1x8x128xf32> to vector<8x128xf32>
    %191 = vector.shape_cast %187 : vector<8x128xf32> to vector<1x8x128xf32>
    tpu.vector_store %arg5[%188, %c0_57, %c0_58], %191 {strides = array<i32>} : memref<8x8x128xf32, #tpu.memory_space<vmem>>, vector<1x8x128xf32>,
    %c5_i32 = arith.constant 5 : i32
    %c8_i32_59 = arith.constant 8 : i32
    %192 = arith.muli %c5_i32, %c8_i32_59 : i32
    %193 = tpu.assume_multiple %192, 8 : i32
    %194 = arith.index_cast %193 : i32 to index
    %c0_60 = arith.constant 0 : index
    %195 = vector.load %arg6[%194, %c0_60] : memref<64x384xf32, #tpu.memory_space<vmem>>, vector<8x384xf32>
    %cst_61 = arith.constant dense<0.000000e+00> : vector<8x128xf32>
    %196 = tpu.matmul %187, %10, %cst_61 {dimension_numbers = #tpu.dot_dimension_numbers<[1], [0], [0], [1], [0, 0, 1, 1], [], []>} : vector<8x128xf32>, vector<128x128xf32>, vector<8x128xf32> -> vector<8x128xf32>
    %cst_62 = arith.constant dense<0.000000e+00> : vector<8x128xf32>
    %197 = tpu.matmul %187, %11, %cst_62 {dimension_numbers = #tpu.dot_dimension_numbers<[1], [0], [0], [1], [0, 0, 1, 1], [], []>} : vector<8x128xf32>, vector<128x128xf32>, vector<8x128xf32> -> vector<8x128xf32>
    %cst_63 = arith.constant dense<0.000000e+00> : vector<8x128xf32>
    %198 = tpu.matmul %187, %12, %cst_63 {dimension_numbers = #tpu.dot_dimension_numbers<[1], [0], [0], [1], [0, 0, 1, 1], [], []>} : vector<8x128xf32>, vector<128x128xf32>, vector<8x128xf32> -> vector<8x128xf32>
    %199 = vector.extract_strided_slice %195 {offsets = [0, 0], sizes = [8, 128], strides = [1, 1]} : vector<8x384xf32> to vector<8x128xf32>
    %200 = arith.addf %199, %196 : vector<8x128xf32>
    %201 = arith.negf %200 : vector<8x128xf32>
    %202 = math.exp %201 : vector<8x128xf32>
    %cst_64 = arith.constant 1.000000e+00 : f32
    %203 = vector.broadcast %cst_64 : f32 to vector<8x128xf32>
    %204 = arith.addf %203, %202 : vector<8x128xf32>
    %205 = arith.divf %203, %204 : vector<8x128xf32>
    %206 = vector.extract_strided_slice %195 {offsets = [0, 128], sizes = [8, 128], strides = [1, 1]} : vector<8x384xf32> to vector<8x128xf32>
    %207 = arith.addf %206, %197 : vector<8x128xf32>
    %208 = arith.negf %207 : vector<8x128xf32>
    %209 = math.exp %208 : vector<8x128xf32>
    %cst_65 = arith.constant 1.000000e+00 : f32
    %210 = vector.broadcast %cst_65 : f32 to vector<8x128xf32>
    %211 = arith.addf %210, %209 : vector<8x128xf32>
    %212 = arith.divf %210, %211 : vector<8x128xf32>
    %213 = vector.extract_strided_slice %195 {offsets = [0, 256], sizes = [8, 128], strides = [1, 1]} : vector<8x384xf32> to vector<8x128xf32>
    %214 = arith.addf %198, %15 : vector<8x128xf32>
    %215 = arith.mulf %205, %214 : vector<8x128xf32>
    %216 = arith.addf %213, %215 : vector<8x128xf32>
    %217 = math.tanh %216 : vector<8x128xf32>
    %cst_66 = arith.constant 1.000000e+00 : f32
    %218 = vector.broadcast %cst_66 : f32 to vector<8x128xf32>
    %219 = arith.subf %218, %212 : vector<8x128xf32>
    %220 = arith.mulf %219, %217 : vector<8x128xf32>
    %221 = arith.mulf %212, %187 : vector<8x128xf32>
    %222 = arith.addf %220, %221 : vector<8x128xf32>
    %223 = arith.index_cast %c5_i32 : i32 to index
    %c0_67 = arith.constant 0 : index
    %c0_68 = arith.constant 0 : index
    %224 = vector.load %arg5[%223, %c0_67, %c0_68] : memref<8x8x128xf32, #tpu.memory_space<vmem>>, vector<1x8x128xf32>
    %225 = vector.shape_cast %224 : vector<1x8x128xf32> to vector<8x128xf32>
    %226 = vector.shape_cast %222 : vector<8x128xf32> to vector<1x8x128xf32>
    tpu.vector_store %arg5[%223, %c0_67, %c0_68], %226 {strides = array<i32>} : memref<8x8x128xf32, #tpu.memory_space<vmem>>, vector<1x8x128xf32>,
    %c6_i32 = arith.constant 6 : i32
    %c8_i32_69 = arith.constant 8 : i32
    %227 = arith.muli %c6_i32, %c8_i32_69 : i32
    %228 = tpu.assume_multiple %227, 8 : i32
    %229 = arith.index_cast %228 : i32 to index
    %c0_70 = arith.constant 0 : index
    %230 = vector.load %arg6[%229, %c0_70] : memref<64x384xf32, #tpu.memory_space<vmem>>, vector<8x384xf32>
    %cst_71 = arith.constant dense<0.000000e+00> : vector<8x128xf32>
    %231 = tpu.matmul %222, %10, %cst_71 {dimension_numbers = #tpu.dot_dimension_numbers<[1], [0], [0], [1], [0, 0, 1, 1], [], []>} : vector<8x128xf32>, vector<128x128xf32>, vector<8x128xf32> -> vector<8x128xf32>
    %cst_72 = arith.constant dense<0.000000e+00> : vector<8x128xf32>
    %232 = tpu.matmul %222, %11, %cst_72 {dimension_numbers = #tpu.dot_dimension_numbers<[1], [0], [0], [1], [0, 0, 1, 1], [], []>} : vector<8x128xf32>, vector<128x128xf32>, vector<8x128xf32> -> vector<8x128xf32>
    %cst_73 = arith.constant dense<0.000000e+00> : vector<8x128xf32>
    %233 = tpu.matmul %222, %12, %cst_73 {dimension_numbers = #tpu.dot_dimension_numbers<[1], [0], [0], [1], [0, 0, 1, 1], [], []>} : vector<8x128xf32>, vector<128x128xf32>, vector<8x128xf32> -> vector<8x128xf32>
    %234 = vector.extract_strided_slice %230 {offsets = [0, 0], sizes = [8, 128], strides = [1, 1]} : vector<8x384xf32> to vector<8x128xf32>
    %235 = arith.addf %234, %231 : vector<8x128xf32>
    %236 = arith.negf %235 : vector<8x128xf32>
    %237 = math.exp %236 : vector<8x128xf32>
    %cst_74 = arith.constant 1.000000e+00 : f32
    %238 = vector.broadcast %cst_74 : f32 to vector<8x128xf32>
    %239 = arith.addf %238, %237 : vector<8x128xf32>
    %240 = arith.divf %238, %239 : vector<8x128xf32>
    %241 = vector.extract_strided_slice %230 {offsets = [0, 128], sizes = [8, 128], strides = [1, 1]} : vector<8x384xf32> to vector<8x128xf32>
    %242 = arith.addf %241, %232 : vector<8x128xf32>
    %243 = arith.negf %242 : vector<8x128xf32>
    %244 = math.exp %243 : vector<8x128xf32>
    %cst_75 = arith.constant 1.000000e+00 : f32
    %245 = vector.broadcast %cst_75 : f32 to vector<8x128xf32>
    %246 = arith.addf %245, %244 : vector<8x128xf32>
    %247 = arith.divf %245, %246 : vector<8x128xf32>
    %248 = vector.extract_strided_slice %230 {offsets = [0, 256], sizes = [8, 128], strides = [1, 1]} : vector<8x384xf32> to vector<8x128xf32>
    %249 = arith.addf %233, %15 : vector<8x128xf32>
    %250 = arith.mulf %240, %249 : vector<8x128xf32>
    %251 = arith.addf %248, %250 : vector<8x128xf32>
    %252 = math.tanh %251 : vector<8x128xf32>
    %cst_76 = arith.constant 1.000000e+00 : f32
    %253 = vector.broadcast %cst_76 : f32 to vector<8x128xf32>
    %254 = arith.subf %253, %247 : vector<8x128xf32>
    %255 = arith.mulf %254, %252 : vector<8x128xf32>
    %256 = arith.mulf %247, %222 : vector<8x128xf32>
    %257 = arith.addf %255, %256 : vector<8x128xf32>
    %258 = arith.index_cast %c6_i32 : i32 to index
    %c0_77 = arith.constant 0 : index
    %c0_78 = arith.constant 0 : index
    %259 = vector.load %arg5[%258, %c0_77, %c0_78] : memref<8x8x128xf32, #tpu.memory_space<vmem>>, vector<1x8x128xf32>
    %260 = vector.shape_cast %259 : vector<1x8x128xf32> to vector<8x128xf32>
    %261 = vector.shape_cast %257 : vector<8x128xf32> to vector<1x8x128xf32>
    tpu.vector_store %arg5[%258, %c0_77, %c0_78], %261 {strides = array<i32>} : memref<8x8x128xf32, #tpu.memory_space<vmem>>, vector<1x8x128xf32>,
    %c7_i32 = arith.constant 7 : i32
    %c8_i32_79 = arith.constant 8 : i32
    %262 = arith.muli %c7_i32, %c8_i32_79 : i32
    %263 = tpu.assume_multiple %262, 8 : i32
    %264 = arith.index_cast %263 : i32 to index
    %c0_80 = arith.constant 0 : index
    %265 = vector.load %arg6[%264, %c0_80] : memref<64x384xf32, #tpu.memory_space<vmem>>, vector<8x384xf32>
    %cst_81 = arith.constant dense<0.000000e+00> : vector<8x128xf32>
    %266 = tpu.matmul %257, %10, %cst_81 {dimension_numbers = #tpu.dot_dimension_numbers<[1], [0], [0], [1], [0, 0, 1, 1], [], []>} : vector<8x128xf32>, vector<128x128xf32>, vector<8x128xf32> -> vector<8x128xf32>
    %cst_82 = arith.constant dense<0.000000e+00> : vector<8x128xf32>
    %267 = tpu.matmul %257, %11, %cst_82 {dimension_numbers = #tpu.dot_dimension_numbers<[1], [0], [0], [1], [0, 0, 1, 1], [], []>} : vector<8x128xf32>, vector<128x128xf32>, vector<8x128xf32> -> vector<8x128xf32>
    %cst_83 = arith.constant dense<0.000000e+00> : vector<8x128xf32>
    %268 = tpu.matmul %257, %12, %cst_83 {dimension_numbers = #tpu.dot_dimension_numbers<[1], [0], [0], [1], [0, 0, 1, 1], [], []>} : vector<8x128xf32>, vector<128x128xf32>, vector<8x128xf32> -> vector<8x128xf32>
    %269 = vector.extract_strided_slice %265 {offsets = [0, 0], sizes = [8, 128], strides = [1, 1]} : vector<8x384xf32> to vector<8x128xf32>
    %270 = arith.addf %269, %266 : vector<8x128xf32>
    %271 = arith.negf %270 : vector<8x128xf32>
    %272 = math.exp %271 : vector<8x128xf32>
    %cst_84 = arith.constant 1.000000e+00 : f32
    %273 = vector.broadcast %cst_84 : f32 to vector<8x128xf32>
    %274 = arith.addf %273, %272 : vector<8x128xf32>
    %275 = arith.divf %273, %274 : vector<8x128xf32>
    %276 = vector.extract_strided_slice %265 {offsets = [0, 128], sizes = [8, 128], strides = [1, 1]} : vector<8x384xf32> to vector<8x128xf32>
    %277 = arith.addf %276, %267 : vector<8x128xf32>
    %278 = arith.negf %277 : vector<8x128xf32>
    %279 = math.exp %278 : vector<8x128xf32>
    %cst_85 = arith.constant 1.000000e+00 : f32
    %280 = vector.broadcast %cst_85 : f32 to vector<8x128xf32>
    %281 = arith.addf %280, %279 : vector<8x128xf32>
    %282 = arith.divf %280, %281 : vector<8x128xf32>
    %283 = vector.extract_strided_slice %265 {offsets = [0, 256], sizes = [8, 128], strides = [1, 1]} : vector<8x384xf32> to vector<8x128xf32>
    %284 = arith.addf %268, %15 : vector<8x128xf32>
    %285 = arith.mulf %275, %284 : vector<8x128xf32>
    %286 = arith.addf %283, %285 : vector<8x128xf32>
    %287 = math.tanh %286 : vector<8x128xf32>
    %cst_86 = arith.constant 1.000000e+00 : f32
    %288 = vector.broadcast %cst_86 : f32 to vector<8x128xf32>
    %289 = arith.subf %288, %282 : vector<8x128xf32>
    %290 = arith.mulf %289, %287 : vector<8x128xf32>
    %291 = arith.mulf %282, %257 : vector<8x128xf32>
    %292 = arith.addf %290, %291 : vector<8x128xf32>
    %293 = arith.index_cast %c7_i32 : i32 to index
    %c0_87 = arith.constant 0 : index
    %c0_88 = arith.constant 0 : index
    %294 = vector.load %arg5[%293, %c0_87, %c0_88] : memref<8x8x128xf32, #tpu.memory_space<vmem>>, vector<1x8x128xf32>
    %295 = vector.shape_cast %294 : vector<1x8x128xf32> to vector<8x128xf32>
    %296 = vector.shape_cast %292 : vector<8x128xf32> to vector<1x8x128xf32>
    tpu.vector_store %arg5[%293, %c0_87, %c0_88], %296 {strides = array<i32>} : memref<8x8x128xf32, #tpu.memory_space<vmem>>, vector<1x8x128xf32>,
    %c8_i32_89 = arith.constant 8 : i32
    return
  }
  func.func @transform_0(%arg0: i32) -> (i32, i32) {
    %c0_i32 = arith.constant 0 : i32
    %c0_i32_0 = arith.constant 0 : i32
    %c0_i32_1 = arith.constant 0 : i32
    return %c0_i32, %c0_i32_0 : i32, i32
  }
  func.func @transform_1(%arg0: i32) -> (i32, i32) {
    %c0_i32 = arith.constant 0 : i32
    %c0_i32_0 = arith.constant 0 : i32
    %c0_i32_1 = arith.constant 0 : i32
    return %c0_i32, %c0_i32_0 : i32, i32
  }
  func.func @transform_2(%arg0: i32) -> (i32, i32) {
    %c0_i32 = arith.constant 0 : i32
    %c0_i32_0 = arith.constant 0 : i32
    %c0_i32_1 = arith.constant 0 : i32
    return %c0_i32, %c0_i32_0 : i32, i32
  }
  func.func @transform_3(%arg0: i32) -> (i32, i32) {
    %c0_i32 = arith.constant 0 : i32
    %c0_i32_0 = arith.constant 0 : i32
    %c0_i32_1 = arith.constant 0 : i32
    return %c0_i32, %c0_i32_0 : i32, i32
  }
  func.func @transform_4(%arg0: i32) -> (i32, i32, i32) {
    %c0_i32 = arith.constant 0 : i32
    %c0_i32_0 = arith.constant 0 : i32
    %c0_i32_1 = arith.constant 0 : i32
    %c0_i32_2 = arith.constant 0 : i32
    return %c0_i32, %c0_i32_0, %c0_i32_1 : i32, i32, i32
  }
}

</mosaic_0001>

<bundles_post_ra>
// kernel: g2p_forward.1
= control target key start
LH: loop header
LB: loop body
LE: loop exit
PB: predicated region body
PF: predicated region fallthrough
CT: control target
= control target key end

     0   :  { %9 = vsyncpa [#allocation4], 0  ;;  %s4380_s15 = smov [#allocation3]   ;;  %s5157_s0 = inlined_call_operand.vmem [shape: s32[64,1], index: 0, kind: input, shape index: {}]   ;;  %s5158_s1 = inlined_call_operand.vmem [shape: f32[32,384], index: 1, kind: input, shape index: {}]   ;;  %s5159_s2 = inlined_call_operand.hbm [shape: f32[128,384], index: 2, kind: input, shape index: {}]   ;;  %s5160_s3 = inlined_call_operand.vmem [shape: f32[1,128], index: 3, kind: input, shape index: {}]   ;;  %s5161_s4 = inlined_call_operand.vmem [shape: f32[8,8,128], index: 4, kind: output, shape index: {}]  }
   0x1   :  { %s19_s16 = sshll.u32 %s4380_s15, 4  ;;  %s4356_s19 = scalar_lea.hbm %s5159_s2, 6144  ;;  %s20_s16 = int_to_ptr.vmem [resolvable:$true] %s19_s16 }
   0x2   :  { %p4357_p0 = scmp.ne.s32.totalorder %s5159_s2, %s4356_s19  ;;  %p4360_p1 = scmp.lt.u32.totalorder %s4356_s19, %s5159_s2 }
   0x4   :  { %p4362_p2 = pnand %p4360_p1, %p4357_p0 }
   0x6   :  { %4365 = shalt.err (!%p4362_p2)
}
   0x7   :  { %s4366_s24 = scalar_lea.vmem %s20_s16, 6144  ;;  %p4371_p4 = scmp.lt.s32.totalorder %s20_s16, %s20_s16 }
   0x8   :  { %p4367_p3 = scmp.ne.s32.totalorder %s20_s16, %s4366_s24  ;;  %p4372_p5 = scmp.lt.s32.totalorder %s4366_s24, %s4366_s24 }
   0xa   :  { %p4373_p6 = por %p4372_p5, %p4371_p4 }
   0xc   :  { %p4374_p7 = pnand %p4373_p6, %p4367_p3 }
   0xe   :  { %4377 = shalt.err (!%p4374_p7)
}
   0xf   :  { %s4381_s25 = smov 384   ;;  %s4382_s26 = smov 24  }
  0x10   :  { %25 = dma.hbm_to_vmem [thread:$0]  %s5159_s2, 6144, %s20_s16, [#allocation4], %s4381_s25, %s4381_s25, %s4382_s26  }
  0x11   :  { %4378 = dma.done.wait [#allocation4], 6144  }
  0x12   :  { %4379 = vsyncadd [#allocation4], 4294961152  ;;  %v4383_v0 = vmov 0   ;;  %v4384_v1 = vmov 0.0   ;;  %v35_v2 = vld [vmem:[%s5157_s0 + $0x10] sm:$0xff]  ;;  %v33_v3 = vld [vmem:[%s5157_s0] sm:$0xff]  ;;  %v31_v29 = vlaneseq }
  0x13   :  { %4274 = vset.pattern.permute.xlu1 %v4383_v0  ;;  %4273 = vset.pattern.permute.xlu0 %v4383_v0  ;;  %v36_v4 = vld [vmem:[%s5157_s0 + $0x18] sm:$0xff]  ;;  %v34_v5 = vld [vmem:[%s5157_s0 + $0x8] sm:$0xff]  ;;  %v93_v7 = vld [vmem:[%s5158_s1 + $0x20] sm:$0xff]  ;;  %v5162_v28 = vmov 0.0|0.0   ;;  %vm101_vm0 = vcmask 261120   ;;  %vm4386_vm9 = vmmov 0  }
  0x14   :  { %190 = vmatprep.mubr.f32.mxu0 %v4384_v1  ;;  %48 = vperm.xlu1 %4274, %v35_v2   ;;  %v90_v6 = vld [vmem:[%s5158_s1 + $0x8] sm:$0xff]  ;;  %v89_v8 = vld [vmem:[%s5158_s1] sm:$0xff]  ;;  %v92_v9 = vld [vmem:[%s5158_s1 + $0x18] sm:$0xff]  ;;  %v4487_v30 = vand.u32 127, %v31_v29 }
  0x15   :  { %42 = vperm.xlu0 %4273, %v33_v3   ;;  %v38_v10 = vld [vmem:[%s5157_s0 + $0x28] sm:$0xff]  ;;  %v3674_v11 = vpack.c.bf16 %v93_v7, %v90_v6  ;;  %v3676_v12 = vpack.c.bf16 %v92_v9, %v89_v8  ;;  %v96_v13 = vld [vmem:[%s5158_s1 + $0x38] sm:$0xff]  ;;  %v99_v14 = vld [vmem:[%s5158_s1 + $0x50] sm:$0xff] }
  0x16   :  { %v91_v15 = vld [vmem:[%s5158_s1 + $0x10] sm:$0xff]  ;;  %v3678_v16 = vpack.c.bf16 %v99_v14, %v96_v13  ;;  %v94_v17 = vld [vmem:[%s5158_s1 + $0x28] sm:$0xff]  ;;  %v37_v20 = vld [vmem:[%s5157_s0 + $0x20] sm:$0xff] }
  0x17   :  { %v95_v18 = vld [vmem:[%s5158_s1 + $0x30] sm:$0xff]  ;;  %v98_v19 = vld [vmem:[%s5158_s1 + $0x48] sm:$0xff]  ;;  %3675 = vmatprep.subr.bf16.mxu0 %v3674_v11  ;;  %v3682_v21 = vpack.c.bf16 %v94_v17, %v91_v15  ;;  %v97_v22 = vld [vmem:[%s5158_s1 + $0x40] sm:$0xff] }
  0x18   :  { %51 = vperm.xlu1 %4274, %v36_v4   ;;  %v100_v23 = vld [vmem:[%s5158_s1 + $0x58] sm:$0xff]  ;;  %3677 = vmatpush1.bf16.msra.mxu0 %v3676_v12  ;;  %v3680_v24 = vpack.c.bf16 %v98_v19, %v95_v18  ;;  %v39_v27 = vld [vmem:[%s5157_s0 + $0x30] sm:$0xff]  ;;  %v368_v31 = vld [vmem:[#allocation3] sm:$0xff] }
  0x19   :  { %45 = vperm.xlu0 %4273, %v34_v5   ;;  %v3686_v25 = vpack.c.bf16 %v100_v23, %v97_v22  ;;  %3679 = vmatprep.subr.bf16.mxu0 %v3678_v16  ;;  %v40_v26 = vld [vmem:[%s5157_s0 + $0x38] sm:$0xff]  ;;  %v374_v36 = vld [vmem:[#allocation3 + $0x30] sm:$0xff]  ;;  %v377_v37 = vld [vmem:[#allocation3 + $0x48] sm:$0xff] }
  0x1a   :  { %3683 = vmatprep.subr.bf16.mxu1 %v3682_v21  ;;  %v371_v32 = vld [vmem:[#allocation3 + $0x18] sm:$0xff]  ;;  %v369_v38 = vld [vmem:[#allocation3 + $0x8] sm:$0xff]  ;;  %v372_v39 = vld [vmem:[#allocation3 + $0x20] sm:$0xff]  ;;  %v4498_v43 = vpack.c.bf16 %v377_v37, %v374_v36 }
  0x1b   :  { %3685 = vmatpush3.bf16.msra.mxu1 %v3682_v21  ;;  %v4489_v35 = vpack.c.bf16 %v371_v32, %v368_v31  ;;  %v4500_v44 = vpack.c.bf16 %v372_v39, %v369_v38  ;;  %v380_v45 = vld [vmem:[#allocation3 + $0x60] sm:$0xff]  ;;  %v383_v46 = vld [vmem:[#allocation3 + $0x78] sm:$0xff]  ;;  %v378_v48 = vld [vmem:[#allocation3 + $0x50] sm:$0xff] }
  0x1c   :  { %57 = vperm.xlu1 %4274, %v38_v10   ;;  %3681 = vmatpush1.bf16.msra.mxu0 %v3680_v24  ;;  %v375_v47 = vld [vmem:[#allocation3 + $0x38] sm:$0xff]  ;;  %v4514_v54 = vpack.c.bf16 %v383_v46, %v380_v45  ;;  %v386_v56 = vld [vmem:[#allocation3 + $0x90] sm:$0xff]  ;;  %v389_v57 = vld [vmem:[#allocation3 + $0xa8] sm:$0xff] }
  0x1d   :  { %54 = vperm.xlu0 %4273, %v37_v20   ;;  %3687 = vmatprep.subr.bf16.mxu1 %v3686_v25  ;;  %v4516_v55 = vpack.c.bf16 %v378_v48, %v375_v47  ;;  %v381_v58 = vld [vmem:[#allocation3 + $0x68] sm:$0xff]  ;;  %v384_v59 = vld [vmem:[#allocation3 + $0x80] sm:$0xff]  ;;  %v4529_v63 = vpack.c.bf16 %v389_v57, %v386_v56  ;;  %v395_v3 = vld [vmem:[#allocation3 + $0xd8] sm:$0xff] }
  0x1e   :  { %3690 = vmatprep.subr.bf16.mxu0 %v5162_v28  ;;  %v4531_v0 = vpack.c.bf16 %v384_v59, %v381_v58  ;;  %v392_v2 = vld [vmem:[#allocation3 + $0xc0] sm:$0xff]  ;;  %v387_v4 = vld [vmem:[#allocation3 + $0x98] sm:$0xff]  ;;  %v390_v5 = vld [vmem:[#allocation3 + $0xb0] sm:$0xff] }
  0x1f   :  { %3689 = vmatpush3.bf16.msra.mxu1 %v3686_v25  ;;  %v4547_v8 = vpack.c.bf16 %v395_v3, %v392_v2  ;;  %v4549_v9 = vpack.c.bf16 %v390_v5, %v387_v4  ;;  %v398_v10 = vld [vmem:[#allocation3 + $0xf0] sm:$0xff]  ;;  %v401_v11 = vld [vmem:[#allocation3 + $0x108] sm:$0xff]  ;;  %v396_v13 = vld [vmem:[#allocation3 + $0xe0] sm:$0xff] }
  0x20   :  { %63 = vperm.xlu1 %4274, %v40_v26   ;;  %3714 = vmatprep.subr.bf16.mxu1 %v5162_v28  ;;  %v393_v12 = vld [vmem:[#allocation3 + $0xc8] sm:$0xff]  ;;  %v4560_v15 = vpack.c.bf16 %v401_v11, %v398_v10  ;;  %v404_v17 = vld [vmem:[#allocation3 + $0x120] sm:$0xff]  ;;  %v407_v18 = vld [vmem:[#allocation3 + $0x138] sm:$0xff] }
  0x21   :  { %60 = vperm.xlu0 %4273, %v39_v27   ;;  %v4562_v16 = vpack.c.bf16 %v396_v13, %v393_v12  ;;  %v399_v19 = vld [vmem:[#allocation3 + $0xf8] sm:$0xff]  ;;  %v402_v20 = vld [vmem:[#allocation3 + $0x110] sm:$0xff]  ;;  %v4572_v21 = vpack.c.bf16 %v407_v18, %v404_v17  ;;  %v413_v24 = vld [vmem:[#allocation3 + $0x168] sm:$0xff] }
  0x22   :  { %v4574_v22 = vpack.c.bf16 %v402_v20, %v399_v19  ;;  %v410_v23 = vld [vmem:[#allocation3 + $0x150] sm:$0xff]  ;;  %v405_v25 = vld [vmem:[#allocation3 + $0x128] sm:$0xff]  ;;  %v408_v26 = vld [vmem:[#allocation3 + $0x140] sm:$0xff] }
  0x23   :  { %v4582_v27 = vpack.c.bf16 %v413_v24, %v410_v23  ;;  %v4584_v29 = vpack.c.bf16 %v408_v26, %v405_v25  ;;  %v414_v31 = vld [vmem:[#allocation3 + $0x170] sm:$0xff]  ;;  %v376_v37 = vld [vmem:[#allocation3 + $0x40] sm:$0xff]  ;;  %v379_v38 = vld [vmem:[#allocation3 + $0x58] sm:$0xff] }
  0x24   :  { %v370_v32 = vld [vmem:[#allocation3 + $0x10] sm:$0xff]  ;;  %v4603_v39 = vpack.c.bf16 %v379_v38, %v376_v37  ;;  %v388_v45 = vld [vmem:[#allocation3 + $0xa0] sm:$0xff]  ;;  %v391_v46 = vld [vmem:[#allocation3 + $0xb8] sm:$0xff] }
  0x25   :  { %v4619_v47 = vpack.c.bf16 %v391_v46, %v388_v45  ;;  %v394_v48 = vld [vmem:[#allocation3 + $0xd0] sm:$0xff]  ;;  %v409_v57 = vld [vmem:[#allocation3 + $0x148] sm:$0xff]  ;;  %v412_v59 = vld [vmem:[#allocation3 + $0x160] sm:$0xff] }
  0x26   :  { %v406_v56 = vld [vmem:[#allocation3 + $0x130] sm:$0xff] }
  0x27   :  { %v4637_v58 = vpack.c.bf16 %v409_v57, %v406_v56  ;;  %v4718_v57 = vld [vmem:[%s5160_s3] ss:$0 sm:$0xff] }
  0x93   :  { %v49_v33 = vpop.permute.xlu1 %48 }
  0x94   :  { %v43_v34 = vpop.permute.xlu0 %42  ;;  %vm67_vm2 = vcmp.eq.s32.totalorder %v49_v33, %v4487_v30  ;;  %v373_v33 = vld [vmem:[#allocation3 + $0x28] sm:$0xff] }
  0x95   :  { %vm65_vm1 = vcmp.eq.s32.totalorder %v43_v34, %v4487_v30  ;;  %v2348_v49 = vsel %vm67_vm2, 1.0, %v4384_v1  ;;  %v4594_v36 = vpack.c.bf16 %v373_v33, %v370_v32 }
  0x96   :  { %v2346_v40 = vsel %vm65_vm1, 1.0, %v4384_v1 }
  0x97   :  { %2354 = vmatmul.mubr.msk.f32.vlgmr.msra.gmra.mrb[0].mxu0 %vm101_vm0, %v2346_v40  ;;  %2822 = vmatprep.mubr.msk.f32.mxu1 %vm101_vm0, %v2346_v40  ;;  %v52_v41 = vpop.permute.xlu1 %51  ;;  %v382_v40 = vld [vmem:[#allocation3 + $0x70] sm:$0xff] }
  0x98   :  { %3692 = vmatpush3.bf16.msra.mxu0 %v4489_v35  ;;  %v46_v42 = vpop.permute.xlu0 %45  ;;  %196 = vmatprep.mubr.f32.mxu0 %v4384_v1  ;;  %vm68_vm3 = vcmp.eq.s32.totalorder %v52_v41, %v4487_v30  ;;  %v385_v41 = vld [vmem:[#allocation3 + $0x88] sm:$0xff] }
  0x99   :  { %vm66_vm4 = vcmp.eq.s32.totalorder %v46_v42, %v4487_v30  ;;  %3693 = vmatprep.subr.bf16.mxu0 %v5162_v28  ;;  %v2349_v51 = vsel %vm68_vm3, 1.0, %v4384_v1  ;;  %v4611_v42 = vpack.c.bf16 %v385_v41, %v382_v40 }
  0x9a   :  { %v2347_v50 = vsel %vm66_vm4, 1.0, %v4384_v1 }
  0x9b   :  { %2355 = vmatmul.mubr.msk.f32.gmra.mrb[2].mxu0 %vm101_vm0, %v2347_v50  ;;  %2823 = vmatmul.mubr.msk.f32.vlgmr.msra.gmra.mrb[0].mxu1 %vm101_vm0, %v2347_v50  ;;  %v58_v52 = vpop.permute.xlu1 %57 }
  0x9c   :  { %3695 = vmatpush3.bf16.msra.mxu0 %v4498_v43  ;;  %3716 = vmatpush3.bf16.msra.mxu1 %v4500_v44  ;;  %v55_v53 = vpop.permute.xlu0 %54  ;;  %vm70_vm6 = vcmp.eq.s32.totalorder %v58_v52, %v4487_v30  ;;  %v403_v52 = vld [vmem:[#allocation3 + $0x118] sm:$0xff] }
  0x9d   :  { %vm69_vm5 = vcmp.eq.s32.totalorder %v55_v53, %v4487_v30  ;;  %202 = vmatprep.mubr.f32.mxu0 %v4384_v1  ;;  %2825 = vmatprep.mubr.msk.f32.mxu1 %vm101_vm0, %v2348_v49  ;;  %v2351_v6 = vsel %vm70_vm6, 1.0, %v4384_v1 }
  0x9e   :  { %v2350_v60 = vsel %vm69_vm5, 1.0, %v4384_v1  ;;  %3696 = vmatprep.subr.bf16.mxu0 %v5162_v28  ;;  %3717 = vmatprep.subr.bf16.mxu1 %v5162_v28 }
  0x9f   :  { %2356 = vmatmul.mubr.msk.f32.gmra.mrb[4].mxu0 %vm101_vm0, %v2348_v49  ;;  %2826 = vmatmul.mubr.msk.f32.gmra.mrb[2].mxu1 %vm101_vm0, %v2349_v51  ;;  %v64_v61 = vpop.permute.xlu1 %63  ;;  %v397_v49 = vld [vmem:[#allocation3 + $0xe8] sm:$0xff] }
  0xa0   :  { %3698 = vmatpush3.bf16.msra.mxu0 %v4514_v54  ;;  %3719 = vmatpush3.bf16.msra.mxu1 %v4516_v55  ;;  %v61_v62 = vpop.permute.xlu0 %60  ;;  %vm72_vm8 = vcmp.eq.s32.totalorder %v64_v61, %v4487_v30  ;;  %v4625_v50 = vpack.c.bf16 %v397_v49, %v394_v48 }
  0xa1   :  { %2828 = vmatprep.mubr.msk.f32.mxu1 %vm101_vm0, %v2350_v60  ;;  %vm71_vm7 = vcmp.eq.s32.totalorder %v61_v62, %v4487_v30  ;;  %208 = vmatprep.mubr.f32.mxu0 %v4384_v1  ;;  %v2353_v14 = vsel %vm72_vm8, 1.0, %v4384_v1  ;;  %v411_v30 = vld [vmem:[#allocation3 + $0x158] sm:$0xff] }
  0xa2   :  { %v2352_v7 = vsel %vm71_vm7, 1.0, %v4384_v1  ;;  %3699 = vmatprep.subr.bf16.mxu0 %v5162_v28  ;;  %3720 = vmatprep.subr.bf16.mxu1 %v5162_v28  ;;  %v4592_v34 = vpack.c.bf16 %v414_v31, %v411_v30 }
  0xa3   :  { %2357 = vmatmul.mubr.msk.f32.gmra.mrb[6].mxu0 %vm101_vm0, %v2349_v51  ;;  %2829 = vmatmul.mubr.msk.f32.gmra.mrb[4].mxu1 %vm101_vm0, %v2351_v6  ;;  %v400_v51 = vld [vmem:[#allocation3 + $0x100] sm:$0xff] }
  0xa4   :  { %3701 = vmatpush3.bf16.msra.mxu0 %v4529_v63  ;;  %3722 = vmatpush3.bf16.msra.mxu1 %v4531_v0  ;;  %v4631_v53 = vpack.c.bf16 %v403_v52, %v400_v51 }
  0xa5   :  { %2831 = vmatprep.mubr.msk.f32.mxu1 %vm101_vm0, %v2352_v7  ;;  %214 = vmatprep.mubr.f32.mxu0 %v4384_v1 }
  0xa6   :  { %3702 = vmatprep.subr.bf16.mxu0 %v5162_v28  ;;  %3723 = vmatprep.subr.bf16.mxu1 %v5162_v28 }
  0xa7   :  { %2358 = vmatmul.mubr.msk.f32.gmra.mrb[8].mxu0 %vm101_vm0, %v2350_v60  ;;  %2832 = vmatmul.mubr.msk.f32.gmra.mrb[6].mxu1 %vm101_vm0, %v2353_v14  ;;  %v415_v60 = vld [vmem:[#allocation3 + $0x178] sm:$0xff] }
  0xa8   :  { %3704 = vmatpush3.bf16.msra.mxu0 %v4547_v8  ;;  %3725 = vmatpush3.bf16.msra.mxu1 %v4549_v9  ;;  %v4643_v61 = vpack.c.bf16 %v415_v60, %v412_v59 }
  0xa9   :  { %220 = vmatprep.mubr.f32.mxu0 %v4384_v1  ;;  %3705 = vmatprep.subr.bf16.mxu0 %v5162_v28 }
  0xaa   :  { %3726 = vmatprep.subr.bf16.mxu1 %v5162_v28  ;;  %2901 = vmatprep.mubr.msk.f32.mxu1 %vm4386_vm9, %v4384_v1 }
  0xab   :  { %2359 = vmatmul.mubr.msk.f32.gmra.mrb[10].mxu0 %vm101_vm0, %v2351_v6 }
  0xac   :  { %3707 = vmatpush3.bf16.msra.mxu0 %v4560_v15  ;;  %3728 = vmatpush3.bf16.msra.mxu1 %v4562_v16 }
  0xad   :  { %226 = vmatprep.mubr.f32.mxu0 %v4384_v1  ;;  %3708 = vmatprep.subr.bf16.mxu0 %v5162_v28 }
  0xae   :  { %3729 = vmatprep.subr.bf16.mxu1 %v5162_v28 }
  0xaf   :  { %2360 = vmatmul.mubr.msk.f32.gmra.mrb[12].mxu0 %vm101_vm0, %v2352_v7 }
  0xb0   :  { %3710 = vmatpush3.bf16.msra.mxu0 %v4572_v21  ;;  %3731 = vmatpush3.bf16.msra.mxu1 %v4574_v22 }
  0xb1   :  { %232 = vmatprep.mubr.f32.mxu0 %v4384_v1  ;;  %3711 = vmatprep.subr.bf16.mxu0 %v5162_v28 }
  0xb2   :  { %3732 = vmatprep.subr.bf16.mxu1 %v5162_v28 }
  0xb3   :  { %2361 = vmatmul.mubr.msk.f32.gmra.mrb[14].mxu0 %vm101_vm0, %v2353_v14 }
  0xb4   :  { %3713 = vmatpush3.bf16.msra.mxu0 %v4582_v27  ;;  %3734 = vmatpush3.bf16.msra.mxu1 %v4584_v29 }
  0xb5   :  { %2866 = vmatprep.mubr.msk.f32.mxu0 %vm4386_vm9, %v4384_v1  ;;  %3735 = vmatprep.subr.bf16.mxu1 %v5162_v28 }
  0xb6   :  { %3738 = vmatprep.subr.bf16.mxu0 %v5162_v28 }
  0xb7   :  { %2867 = vmatmul.mubr.f32.vlgmr.msra.gmra.mrb[16].mxu0 %v4384_v1 }
  0xb8   :  { %3737 = vmatpush3.bf16.msra.mxu1 %v4592_v34  ;;  %3740 = vmatpush3.bf16.msra.mxu0 %v4594_v36 }
  0xb9   :  { %3741 = vmatprep.subr.bf16.mxu0 %v5162_v28  ;;  %2936 = vmatprep.mubr.msk.f32.mxu0 %vm4386_vm9, %v4384_v1 }
  0xba   :  { %3762 = vmatprep.subr.bf16.mxu1 %v5162_v28 }
  0xbb   :  { %2902 = vmatmul.mubr.f32.vlgmr.msra.gmra.mrb[8].mxu1 %v4384_v1 }
  0xbc   :  { %3743 = vmatpush3.bf16.msra.mxu0 %v4603_v39  ;;  %3764 = vmatpush3.bf16.msra.mxu1 %v4489_v35 }
  0xbd   :  { %3744 = vmatprep.subr.bf16.mxu0 %v5162_v28  ;;  %3765 = vmatprep.subr.bf16.mxu1 %v5162_v28 }
  0xbe   :  { %2971 = vmatprep.mubr.msk.f32.mxu1 %vm4386_vm9, %v4384_v1 }
  0xc0   :  { %3746 = vmatpush3.bf16.msra.mxu0 %v4611_v42  ;;  %3767 = vmatpush3.bf16.msra.mxu1 %v4498_v43 }
  0xc1   :  { %3747 = vmatprep.subr.bf16.mxu0 %v5162_v28  ;;  %3768 = vmatprep.subr.bf16.mxu1 %v5162_v28 }
  0xc4   :  { %3749 = vmatpush3.bf16.msra.mxu0 %v4619_v47  ;;  %3770 = vmatpush3.bf16.msra.mxu1 %v4514_v54 }
  0xc5   :  { %3750 = vmatprep.subr.bf16.mxu0 %v5162_v28  ;;  %3771 = vmatprep.subr.bf16.mxu1 %v5162_v28 }
  0xc8   :  { %3752 = vmatpush3.bf16.msra.mxu0 %v4625_v50  ;;  %3773 = vmatpush3.bf16.msra.mxu1 %v4529_v63 }
  0xc9   :  { %3753 = vmatprep.subr.bf16.mxu0 %v5162_v28  ;;  %3774 = vmatprep.subr.bf16.mxu1 %v5162_v28 }
  0xcc   :  { %3755 = vmatpush3.bf16.msra.mxu0 %v4631_v53  ;;  %3776 = vmatpush3.bf16.msra.mxu1 %v4547_v8 }
  0xcd   :  { %3756 = vmatprep.subr.bf16.mxu0 %v5162_v28  ;;  %3777 = vmatprep.subr.bf16.mxu1 %v5162_v28 }
  0xd0   :  { %3758 = vmatpush3.bf16.msra.mxu0 %v4637_v58  ;;  %3779 = vmatpush3.bf16.msra.mxu1 %v4560_v15 }
  0xd1   :  { %3759 = vmatprep.subr.bf16.mxu0 %v5162_v28  ;;  %3780 = vmatprep.subr.bf16.mxu1 %v5162_v28 }
  0xd4   :  { %3761 = vmatpush3.bf16.msra.mxu0 %v4643_v61  ;;  %3782 = vmatpush3.bf16.msra.mxu1 %v4572_v21 }
  0xd5   :  { %3786 = vmatprep.subr.bf16.mxu0 %v5162_v28  ;;  %3783 = vmatprep.subr.bf16.mxu1 %v5162_v28 }
  0xd7   :  { %2937 = vmatmul.mubr.f32.vlgmr.msra.gmra.mrb[18].mxu0 %v4384_v1 }
  0xd8   :  { %3788 = vmatpush3.bf16.msra.mxu0 %v4500_v44  ;;  %3785 = vmatpush3.bf16.msra.mxu1 %v4582_v27 }
  0xd9   :  { %3789 = vmatprep.subr.bf16.mxu0 %v5162_v28  ;;  %3006 = vmatprep.mubr.msk.f32.mxu0 %vm4386_vm9, %v4384_v1 }
  0xda   :  { %3810 = vmatprep.subr.bf16.mxu1 %v5162_v28 }
  0xdc   :  { %3791 = vmatpush3.bf16.msra.mxu0 %v4516_v55 }
  0xdd   :  { %3792 = vmatprep.subr.bf16.mxu0 %v5162_v28 }
  0xe0   :  { %3794 = vmatpush3.bf16.msra.mxu0 %v4531_v0 }
  0xe1   :  { %3795 = vmatprep.subr.bf16.mxu0 %v5162_v28 }
  0xe4   :  { %3797 = vmatpush3.bf16.msra.mxu0 %v4549_v9 }
  0xe5   :  { %3798 = vmatprep.subr.bf16.mxu0 %v5162_v28 }
  0xe8   :  { %3800 = vmatpush3.bf16.msra.mxu0 %v4562_v16 }
  0xe9   :  { %3801 = vmatprep.subr.bf16.mxu0 %v5162_v28 }
  0xec   :  { %3803 = vmatpush3.bf16.msra.mxu0 %v4574_v22 }
  0xed   :  { %3804 = vmatprep.subr.bf16.mxu0 %v5162_v28 }
  0xf0   :  { %3806 = vmatpush3.bf16.msra.mxu0 %v4584_v29 }
  0xf1   :  { %3807 = vmatprep.subr.bf16.mxu0 %v5162_v28 }
  0xf4   :  { %3809 = vmatpush3.bf16.msra.mxu0 %v4592_v34 }
  0xf5   :  { %3834 = vmatprep.subr.bf16.mxu0 %v5162_v28 }
 0x16a   :  { %v192_v62 = vpop.f32.mrb[0].mxu0 }
 0x16b   :  { %v194_v2 = vpop.f32.mrb[1].mxu0 }
 0x16e   :  { %v4673_v3 = vpop.f32.mrb[2].mxu0  ;;  %v4675_v4 = vpop.f32.mrb[0].mxu1 }
 0x16f   :  { %v4677_v5 = vpop.f32.mrb[3].mxu0  ;;  %v305_v6 = vpop.f32.mrb[1].mxu1 }
 0x172   :  { %v4679_v7 = vpop.f32.mrb[4].mxu0  ;;  %v4681_v10 = vpop.f32.mrb[2].mxu1 }
 0x173   :  { %v4683_v11 = vpop.f32.mrb[5].mxu0  ;;  %v4685_v12 = vpop.f32.mrb[3].mxu1 }
 0x176   :  { %v4687_v13 = vpop.f32.mrb[6].mxu0  ;;  %v4689_v14 = vpop.f32.mrb[4].mxu1 }
 0x177   :  { %v4691_v17 = vpop.f32.mrb[7].mxu0  ;;  %v4693_v18 = vpop.f32.mrb[5].mxu1 }
 0x17a   :  { %v4695_v19 = vpop.f32.mrb[8].mxu0  ;;  %v4697_v20 = vpop.f32.mrb[6].mxu1 }
 0x17b   :  { %v4699_v23 = vpop.f32.mrb[9].mxu0  ;;  %v4701_v24 = vpop.f32.mrb[7].mxu1 }
 0x17e   :  { %v4703_v25 = vpop.f32.mrb[10].mxu0 }
 0x17f   :  { %v4705_v26 = vpop.f32.mrb[11].mxu0 }
 0x182   :  { %v4707_v30 = vpop.f32.mrb[12].mxu0 }
 0x183   :  { %v4709_v31 = vpop.f32.mrb[13].mxu0 }
 0x186   :  { %v4711_v32 = vpop.f32.mrb[14].mxu0 }
 0x187   :  { %v4713_v33 = vpop.f32.mrb[15].mxu0 }
 0x18a   :  { %v495_v37 = vpop.f32.mrb[16].mxu0 }
 0x18b   :  { %v569_v38 = vadd.f32 %v495_v37, %v192_v62  ;;  %v2868_v40 = vpop.f32.mrb[17].mxu0 }
 0x18d   :  { %v2371_v41 = vmul.f32 -1.442695, %v569_v38 }
 0x18e   :  { %v565_v45 = vpop.f32.mrb[8].mxu1 }
 0x18f   :  { %v576_v46 = vadd.f32 %v565_v45, %v194_v2  ;;  %v2903_v48 = vpop.f32.mrb[9].mxu1  ;;  %4275 = vpow2.f32 %v2371_v41 }
 0x191   :  { %v2372_v49 = vmul.f32 -1.442695, %v576_v46 }
 0x193   :  { %4277 = vpow2.f32 %v2372_v49 }
 0x199   :  { %v4276_v51 = vpop.eup %4275 }
 0x19a   :  { %v573_v52 = vadd.f32 1.0, %v4276_v51 }
 0x19c   :  { %4279 = vrcp.f32 %v573_v52 }
 0x19d   :  { %v4278_v56 = vpop.eup %4277 }
 0x19e   :  { %v580_v59 = vadd.f32 1.0, %v4278_v56 }
 0x1a0   :  { %4281 = vrcp.f32 %v580_v59 }
 0x1a6   :  { %v4280_v38 = vpop.eup %4279 }
 0x1aa   :  { %v649_v60 = vpop.f32.mrb[18].mxu0  ;;  %v4282_v41 = vpop.eup %4281 }
 0x1ab   :  { %v650_v62 = vadd.f32 %v4718_v57, %v649_v60  ;;  %v2938_v37 = vpop.f32.mrb[19].mxu0  ;;  %v656_v45 = vsub.f32 1.0, %v4282_v41  ;;  %v658_v49 = vmul.f32 0.0, %v4282_v41 }
 0x1ad   :  { %v653_v2 = vmul.f32 %v4280_v38, %v650_v62 }
 0x1af   :  { %v654_v40 = vadd.f32 %v653_v2, %v305_v6 }
 0x1b1   :  { %4283 = vtanh.f32 %v654_v40 }
 0x1bb   :  { %v4284_v46 = vpop.eup %4283 }
 0x1bc   :  { %v657_v48 = vmul.f32 %v4284_v46, %v656_v45 }
 0x1be   :  { %v4721_v51 = vadd.f32 %v658_v49, %v657_v48 }
 0x1c0   :  { %660 = vst [vmem:[%s5161_s4] sm:$0xff] %v4721_v51  ;;  %2972 = vmatmul.mubr.f32.vlgmr.msra.gmra.mrb[10].mxu1 %v4721_v51  ;;  %3007 = vmatmul.mubr.f32.vlgmr.msra.gmra.mrb[20].mxu0 %v4721_v51 }
 0x1c1   :  { %3812 = vmatpush3.bf16.msra.mxu1 %v4594_v36  ;;  %3041 = vmatprep.mubr.msk.f32.mxu1 %vm4386_vm9, %v4384_v1 }
 0x1c2   :  { %3813 = vmatprep.subr.bf16.mxu1 %v5162_v28  ;;  %3836 = vmatpush3.bf16.msra.mxu0 %v4489_v35 }
 0x1c3   :  { %3837 = vmatprep.subr.bf16.mxu0 %v5162_v28  ;;  %3076 = vmatprep.mubr.msk.f32.mxu0 %vm4386_vm9, %v4384_v1 }
 0x1c5   :  { %3815 = vmatpush3.bf16.msra.mxu1 %v4603_v39 }
 0x1c6   :  { %3816 = vmatprep.subr.bf16.mxu1 %v5162_v28  ;;  %3839 = vmatpush3.bf16.msra.mxu0 %v4498_v43 }
 0x1c7   :  { %3840 = vmatprep.subr.bf16.mxu0 %v5162_v28 }
 0x1c9   :  { %3818 = vmatpush3.bf16.msra.mxu1 %v4611_v42 }
 0x1ca   :  { %3819 = vmatprep.subr.bf16.mxu1 %v5162_v28  ;;  %3842 = vmatpush3.bf16.msra.mxu0 %v4514_v54 }
 0x1cb   :  { %3843 = vmatprep.subr.bf16.mxu0 %v5162_v28 }
 0x1cd   :  { %3821 = vmatpush3.bf16.msra.mxu1 %v4619_v47 }
 0x1ce   :  { %3822 = vmatprep.subr.bf16.mxu1 %v5162_v28  ;;  %3845 = vmatpush3.bf16.msra.mxu0 %v4529_v63 }
 0x1cf   :  { %3846 = vmatprep.subr.bf16.mxu0 %v5162_v28 }
 0x1d1   :  { %3824 = vmatpush3.bf16.msra.mxu1 %v4625_v50 }
 0x1d2   :  { %3825 = vmatprep.subr.bf16.mxu1 %v5162_v28  ;;  %3848 = vmatpush3.bf16.msra.mxu0 %v4547_v8 }
 0x1d3   :  { %3849 = vmatprep.subr.bf16.mxu0 %v5162_v28 }
 0x1d5   :  { %3827 = vmatpush3.bf16.msra.mxu1 %v4631_v53 }
 0x1d6   :  { %3828 = vmatprep.subr.bf16.mxu1 %v5162_v28  ;;  %3851 = vmatpush3.bf16.msra.mxu0 %v4560_v15 }
 0x1d7   :  { %3852 = vmatprep.subr.bf16.mxu0 %v5162_v28 }
 0x1d9   :  { %3830 = vmatpush3.bf16.msra.mxu1 %v4637_v58 }
 0x1da   :  { %3831 = vmatprep.subr.bf16.mxu1 %v5162_v28  ;;  %3854 = vmatpush3.bf16.msra.mxu0 %v4572_v21 }
 0x1db   :  { %3855 = vmatprep.subr.bf16.mxu0 %v5162_v28 }
 0x1dd   :  { %3833 = vmatpush3.bf16.msra.mxu1 %v4643_v61 }
 0x1de   :  { %3858 = vmatprep.subr.bf16.mxu1 %v5162_v28  ;;  %3857 = vmatpush3.bf16.msra.mxu0 %v4582_v27 }
 0x1df   :  { %3882 = vmatprep.subr.bf16.mxu0 %v5162_v28 }
 0x1e0   :  { %3042 = vmatmul.mubr.f32.vlgmr.msra.gmra.mrb[12].mxu1 %v4721_v51 }
 0x1e1   :  { %3860 = vmatpush3.bf16.msra.mxu1 %v4500_v44  ;;  %3111 = vmatprep.mubr.msk.f32.mxu1 %vm4386_vm9, %v4384_v1 }
 0x1e2   :  { %3861 = vmatprep.subr.bf16.mxu1 %v5162_v28 }
 0x1e5   :  { %3863 = vmatpush3.bf16.msra.mxu1 %v4516_v55 }
 0x1e6   :  { %3864 = vmatprep.subr.bf16.mxu1 %v5162_v28 }
 0x1e9   :  { %3866 = vmatpush3.bf16.msra.mxu1 %v4531_v0 }
 0x1ea   :  { %3867 = vmatprep.subr.bf16.mxu1 %v5162_v28 }
 0x1ed   :  { %3869 = vmatpush3.bf16.msra.mxu1 %v4549_v9 }
 0x1ee   :  { %3870 = vmatprep.subr.bf16.mxu1 %v5162_v28 }
 0x1f1   :  { %3872 = vmatpush3.bf16.msra.mxu1 %v4562_v16 }
 0x1f2   :  { %3873 = vmatprep.subr.bf16.mxu1 %v5162_v28 }
 0x1f5   :  { %3875 = vmatpush3.bf16.msra.mxu1 %v4574_v22 }
 0x1f6   :  { %3876 = vmatprep.subr.bf16.mxu1 %v5162_v28 }
 0x1f9   :  { %3878 = vmatpush3.bf16.msra.mxu1 %v4584_v29 }
 0x1fa   :  { %3879 = vmatprep.subr.bf16.mxu1 %v5162_v28 }
 0x1fd   :  { %3881 = vmatpush3.bf16.msra.mxu1 %v4592_v34 }
 0x1fe   :  { %3906 = vmatprep.subr.bf16.mxu1 %v5162_v28 }
 0x293   :  { %v733_v6 = vpop.f32.mrb[10].mxu1  ;;  %v803_v52 = vpop.f32.mrb[20].mxu0 }
 0x294   :  { %v807_v56 = vadd.f32 %v733_v6, %v4673_v3  ;;  %v814_v59 = vadd.f32 %v803_v52, %v4677_v5  ;;  %v2973_v60 = vpop.f32.mrb[11].mxu1  ;;  %v3008_v62 = vpop.f32.mrb[21].mxu0 }
 0x296   :  { %v2373_v37 = vmul.f32 -1.442695, %v807_v56  ;;  %v2374_v38 = vmul.f32 -1.442695, %v814_v59 }
 0x298   :  { %4285 = vpow2.f32 %v2373_v37 }
 0x299   :  { %4287 = vpow2.f32 %v2374_v38 }
 0x2a2   :  { %v4286_v2 = vpop.eup %4285 }
 0x2a3   :  { %v811_v40 = vadd.f32 1.0, %v4286_v2  ;;  %v4288_v41 = vpop.eup %4287 }
 0x2a4   :  { %v818_v45 = vadd.f32 1.0, %v4288_v41 }
 0x2a5   :  { %4289 = vrcp.f32 %v811_v40 }
 0x2a6   :  { %4291 = vrcp.f32 %v818_v45 }
 0x2af   :  { %v4290_v28 = vpop.eup %4289 }
 0x2b0   :  { %v4292_v6 = vpop.eup %4291 }
 0x2b1   :  { %v894_v52 = vsub.f32 1.0, %v4292_v6  ;;  %v896_v60 = vmul.f32 %v4292_v6, %v4721_v51 }
 0x2b3   :  { %v887_v46 = vpop.f32.mrb[12].mxu1 }
 0x2b4   :  { %v888_v48 = vadd.f32 %v4718_v57, %v887_v46  ;;  %v3043_v49 = vpop.f32.mrb[13].mxu1 }
 0x2b6   :  { %v891_v3 = vmul.f32 %v4290_v28, %v888_v48  ;;  %v5164_v28 = vmov 0.0|0.0  }
 0x2b8   :  { %v892_v5 = vadd.f32 %v4675_v4, %v891_v3 }
 0x2ba   :  { %4293 = vtanh.f32 %v892_v5 }
 0x2c4   :  { %v4294_v56 = vpop.eup %4293 }
 0x2c5   :  { %v895_v59 = vmul.f32 %v4294_v56, %v894_v52 }
 0x2c7   :  { %v4789_v62 = vadd.f32 %v896_v60, %v895_v59 }
 0x2c9   :  { %2375 = vst [vmem:[%s5161_s4 + $0x8] sm:$0xff] %v4789_v62  ;;  %3077 = vmatmul.mubr.f32.vlgmr.msra.gmra.mrb[22].mxu0 %v4789_v62  ;;  %3112 = vmatmul.mubr.f32.vlgmr.msra.gmra.mrb[14].mxu1 %v4789_v62 }
 0x2ca   :  { %3884 = vmatpush3.bf16.msra.mxu0 %v4594_v36  ;;  %3146 = vmatprep.mubr.msk.f32.mxu0 %vm4386_vm9, %v4384_v1 }
 0x2cb   :  { %3885 = vmatprep.subr.bf16.mxu0 %v5164_v28  ;;  %3908 = vmatpush3.bf16.msra.mxu1 %v4489_v35 }
 0x2cc   :  { %3909 = vmatprep.subr.bf16.mxu1 %v5164_v28  ;;  %3181 = vmatprep.mubr.msk.f32.mxu1 %vm4386_vm9, %v4384_v1 }
 0x2ce   :  { %3887 = vmatpush3.bf16.msra.mxu0 %v4603_v39 }
 0x2cf   :  { %3888 = vmatprep.subr.bf16.mxu0 %v5164_v28  ;;  %3911 = vmatpush3.bf16.msra.mxu1 %v4498_v43 }
 0x2d0   :  { %3912 = vmatprep.subr.bf16.mxu1 %v5164_v28 }
 0x2d2   :  { %3890 = vmatpush3.bf16.msra.mxu0 %v4611_v42 }
 0x2d3   :  { %3891 = vmatprep.subr.bf16.mxu0 %v5164_v28  ;;  %3914 = vmatpush3.bf16.msra.mxu1 %v4514_v54 }
 0x2d4   :  { %3915 = vmatprep.subr.bf16.mxu1 %v5164_v28 }
 0x2d6   :  { %3893 = vmatpush3.bf16.msra.mxu0 %v4619_v47 }
 0x2d7   :  { %3894 = vmatprep.subr.bf16.mxu0 %v5164_v28  ;;  %3917 = vmatpush3.bf16.msra.mxu1 %v4529_v63 }
 0x2d8   :  { %3918 = vmatprep.subr.bf16.mxu1 %v5164_v28 }
 0x2da   :  { %3896 = vmatpush3.bf16.msra.mxu0 %v4625_v50 }
 0x2db   :  { %3897 = vmatprep.subr.bf16.mxu0 %v5164_v28  ;;  %3920 = vmatpush3.bf16.msra.mxu1 %v4547_v8 }
 0x2dc   :  { %3921 = vmatprep.subr.bf16.mxu1 %v5164_v28 }
 0x2de   :  { %3899 = vmatpush3.bf16.msra.mxu0 %v4631_v53 }
 0x2df   :  { %3900 = vmatprep.subr.bf16.mxu0 %v5164_v28  ;;  %3923 = vmatpush3.bf16.msra.mxu1 %v4560_v15 }
 0x2e0   :  { %3924 = vmatprep.subr.bf16.mxu1 %v5164_v28 }
 0x2e2   :  { %3902 = vmatpush3.bf16.msra.mxu0 %v4637_v58 }
 0x2e3   :  { %3903 = vmatprep.subr.bf16.mxu0 %v5164_v28  ;;  %3926 = vmatpush3.bf16.msra.mxu1 %v4572_v21 }
 0x2e4   :  { %3927 = vmatprep.subr.bf16.mxu1 %v5164_v28 }
 0x2e6   :  { %3905 = vmatpush3.bf16.msra.mxu0 %v4643_v61 }
 0x2e7   :  { %3930 = vmatprep.subr.bf16.mxu0 %v5164_v28  ;;  %3929 = vmatpush3.bf16.msra.mxu1 %v4582_v27 }
 0x2e8   :  { %3954 = vmatprep.subr.bf16.mxu1 %v5164_v28 }
 0x2e9   :  { %3147 = vmatmul.mubr.f32.vlgmr.msra.gmra.mrb[24].mxu0 %v4789_v62 }
 0x2ea   :  { %3932 = vmatpush3.bf16.msra.mxu0 %v4500_v44  ;;  %3216 = vmatprep.mubr.msk.f32.mxu0 %vm4386_vm9, %v4384_v1 }
 0x2eb   :  { %3933 = vmatprep.subr.bf16.mxu0 %v5164_v28 }
 0x2ee   :  { %3935 = vmatpush3.bf16.msra.mxu0 %v4516_v55 }
 0x2ef   :  { %3936 = vmatprep.subr.bf16.mxu0 %v5164_v28 }
 0x2f2   :  { %3938 = vmatpush3.bf16.msra.mxu0 %v4531_v0 }
 0x2f3   :  { %3939 = vmatprep.subr.bf16.mxu0 %v5164_v28 }
 0x2f6   :  { %3941 = vmatpush3.bf16.msra.mxu0 %v4549_v9 }
 0x2f7   :  { %3942 = vmatprep.subr.bf16.mxu0 %v5164_v28 }
 0x2fa   :  { %3944 = vmatpush3.bf16.msra.mxu0 %v4562_v16 }
 0x2fb   :  { %3945 = vmatprep.subr.bf16.mxu0 %v5164_v28 }
 0x2fe   :  { %3947 = vmatpush3.bf16.msra.mxu0 %v4574_v22 }
 0x2ff   :  { %3948 = vmatprep.subr.bf16.mxu0 %v5164_v28 }
 0x302   :  { %3950 = vmatpush3.bf16.msra.mxu0 %v4584_v29 }
 0x303   :  { %3951 = vmatprep.subr.bf16.mxu0 %v5164_v28 }
 0x306   :  { %3953 = vmatpush3.bf16.msra.mxu0 %v4592_v34 }
 0x307   :  { %3978 = vmatprep.subr.bf16.mxu0 %v5164_v28 }
 0x39c   :  { %v972_v4 = vpop.f32.mrb[22].mxu0  ;;  %v1042_v51 = vpop.f32.mrb[14].mxu1 }
 0x39d   :  { %v1046_v37 = vadd.f32 %v972_v4, %v4679_v7  ;;  %v1053_v38 = vadd.f32 %v1042_v51, %v4683_v11  ;;  %v3078_v2 = vpop.f32.mrb[23].mxu0  ;;  %v3113_v40 = vpop.f32.mrb[15].mxu1 }
 0x39f   :  { %v2376_v41 = vmul.f32 -1.442695, %v1046_v37  ;;  %v2377_v45 = vmul.f32 -1.442695, %v1053_v38 }
 0x3a1   :  { %4295 = vpow2.f32 %v2376_v41 }
 0x3a2   :  { %4297 = vpow2.f32 %v2377_v45 }
 0x3ab   :  { %v4296_v46 = vpop.eup %4295 }
 0x3ac   :  { %v1050_v48 = vadd.f32 1.0, %v4296_v46  ;;  %v4298_v49 = vpop.eup %4297 }
 0x3ad   :  { %v1057_v3 = vadd.f32 1.0, %v4298_v49 }
 0x3ae   :  { %4299 = vrcp.f32 %v1050_v48 }
 0x3af   :  { %4301 = vrcp.f32 %v1057_v3 }
 0x3b8   :  { %v4300_v56 = vpop.eup %4299 }
 0x3b9   :  { %v4302_v59 = vpop.eup %4301 }
 0x3ba   :  { %v1133_v60 = vsub.f32 1.0, %v4302_v59  ;;  %v1135_v37 = vmul.f32 %v4302_v59, %v4789_v62 }
 0x3bc   :  { %v1126_v5 = vpop.f32.mrb[24].mxu0 }
 0x3bd   :  { %v1127_v6 = vadd.f32 %v4718_v57, %v1126_v5  ;;  %v3148_v52 = vpop.f32.mrb[25].mxu0 }
 0x3bf   :  { %v1130_v7 = vmul.f32 %v4300_v56, %v1127_v6 }
 0x3c1   :  { %v1131_v11 = vadd.f32 %v1130_v7, %v4685_v12 }
 0x3c3   :  { %4303 = vtanh.f32 %v1131_v11 }
 0x3cd   :  { %v4304_v4 = vpop.eup %4303 }
 0x3ce   :  { %v1134_v51 = vmul.f32 %v4304_v4, %v1133_v60 }
 0x3d0   :  { %v4857_v38 = vadd.f32 %v1135_v37, %v1134_v51 }
 0x3d2   :  { %2378 = vst [vmem:[%s5161_s4 + $0x10] sm:$0xff] %v4857_v38  ;;  %3182 = vmatmul.mubr.f32.vlgmr.msra.gmra.mrb[16].mxu1 %v4857_v38  ;;  %3217 = vmatmul.mubr.f32.vlgmr.msra.gmra.mrb[26].mxu0 %v4857_v38 }
 0x3d3   :  { %3956 = vmatpush3.bf16.msra.mxu1 %v4594_v36  ;;  %3251 = vmatprep.mubr.msk.f32.mxu1 %vm4386_vm9, %v4384_v1 }
 0x3d4   :  { %3957 = vmatprep.subr.bf16.mxu1 %v5164_v28  ;;  %3980 = vmatpush3.bf16.msra.mxu0 %v4489_v35 }
 0x3d5   :  { %3981 = vmatprep.subr.bf16.mxu0 %v5164_v28  ;;  %3286 = vmatprep.mubr.msk.f32.mxu0 %vm4386_vm9, %v4384_v1 }
 0x3d7   :  { %3959 = vmatpush3.bf16.msra.mxu1 %v4603_v39 }
 0x3d8   :  { %3960 = vmatprep.subr.bf16.mxu1 %v5164_v28  ;;  %3983 = vmatpush3.bf16.msra.mxu0 %v4498_v43 }
 0x3d9   :  { %3984 = vmatprep.subr.bf16.mxu0 %v5164_v28 }
 0x3db   :  { %3962 = vmatpush3.bf16.msra.mxu1 %v4611_v42 }
 0x3dc   :  { %3963 = vmatprep.subr.bf16.mxu1 %v5164_v28  ;;  %3986 = vmatpush3.bf16.msra.mxu0 %v4514_v54 }
 0x3dd   :  { %3987 = vmatprep.subr.bf16.mxu0 %v5164_v28 }
 0x3df   :  { %3965 = vmatpush3.bf16.msra.mxu1 %v4619_v47 }
 0x3e0   :  { %3966 = vmatprep.subr.bf16.mxu1 %v5164_v28  ;;  %3989 = vmatpush3.bf16.msra.mxu0 %v4529_v63 }
 0x3e1   :  { %3990 = vmatprep.subr.bf16.mxu0 %v5164_v28 }
 0x3e3   :  { %3968 = vmatpush3.bf16.msra.mxu1 %v4625_v50 }
 0x3e4   :  { %3969 = vmatprep.subr.bf16.mxu1 %v5164_v28  ;;  %3992 = vmatpush3.bf16.msra.mxu0 %v4547_v8 }
 0x3e5   :  { %3993 = vmatprep.subr.bf16.mxu0 %v5164_v28 }
 0x3e7   :  { %3971 = vmatpush3.bf16.msra.mxu1 %v4631_v53 }
 0x3e8   :  { %3972 = vmatprep.subr.bf16.mxu1 %v5164_v28  ;;  %3995 = vmatpush3.bf16.msra.mxu0 %v4560_v15 }
 0x3e9   :  { %3996 = vmatprep.subr.bf16.mxu0 %v5164_v28 }
 0x3eb   :  { %3974 = vmatpush3.bf16.msra.mxu1 %v4637_v58 }
 0x3ec   :  { %3975 = vmatprep.subr.bf16.mxu1 %v5164_v28  ;;  %3998 = vmatpush3.bf16.msra.mxu0 %v4572_v21 }
 0x3ed   :  { %3999 = vmatprep.subr.bf16.mxu0 %v5164_v28 }
 0x3ef   :  { %3977 = vmatpush3.bf16.msra.mxu1 %v4643_v61 }
 0x3f0   :  { %4002 = vmatprep.subr.bf16.mxu1 %v5164_v28  ;;  %4001 = vmatpush3.bf16.msra.mxu0 %v4582_v27 }
 0x3f1   :  { %4026 = vmatprep.subr.bf16.mxu0 %v5164_v28 }
 0x3f2   :  { %3252 = vmatmul.mubr.f32.vlgmr.msra.gmra.mrb[18].mxu1 %v4857_v38 }
 0x3f3   :  { %4004 = vmatpush3.bf16.msra.mxu1 %v4500_v44  ;;  %3321 = vmatprep.mubr.msk.f32.mxu1 %vm4386_vm9, %v4384_v1 }
 0x3f4   :  { %4005 = vmatprep.subr.bf16.mxu1 %v5164_v28 }
 0x3f7   :  { %4007 = vmatpush3.bf16.msra.mxu1 %v4516_v55 }
 0x3f8   :  { %4008 = vmatprep.subr.bf16.mxu1 %v5164_v28 }
 0x3fb   :  { %4010 = vmatpush3.bf16.msra.mxu1 %v4531_v0 }
 0x3fc   :  { %4011 = vmatprep.subr.bf16.mxu1 %v5164_v28 }
 0x3ff   :  { %4013 = vmatpush3.bf16.msra.mxu1 %v4549_v9 }
 0x400   :  { %4014 = vmatprep.subr.bf16.mxu1 %v5164_v28 }
 0x403   :  { %4016 = vmatpush3.bf16.msra.mxu1 %v4562_v16 }
 0x404   :  { %4017 = vmatprep.subr.bf16.mxu1 %v5164_v28 }
 0x407   :  { %4019 = vmatpush3.bf16.msra.mxu1 %v4574_v22 }
 0x408   :  { %4020 = vmatprep.subr.bf16.mxu1 %v5164_v28 }
 0x40b   :  { %4022 = vmatpush3.bf16.msra.mxu1 %v4584_v29 }
 0x40c   :  { %4023 = vmatprep.subr.bf16.mxu1 %v5164_v28 }
 0x40f   :  { %4025 = vmatpush3.bf16.msra.mxu1 %v4592_v34 }
 0x410   :  { %4050 = vmatprep.subr.bf16.mxu1 %v5164_v28 }
 0x4a5   :  { %v1211_v12 = vpop.f32.mrb[16].mxu1  ;;  %v1281_v62 = vpop.f32.mrb[26].mxu0 }
 0x4a6   :  { %v1285_v2 = vadd.f32 %v1211_v12, %v4687_v13  ;;  %v1292_v40 = vadd.f32 %v1281_v62, %v4691_v17  ;;  %v3183_v41 = vpop.f32.mrb[17].mxu1  ;;  %v3218_v45 = vpop.f32.mrb[27].mxu0 }
 0x4a8   :  { %v2379_v46 = vmul.f32 -1.442695, %v1285_v2  ;;  %v2380_v48 = vmul.f32 -1.442695, %v1292_v40 }
 0x4aa   :  { %4305 = vpow2.f32 %v2379_v46 }
 0x4ab   :  { %4307 = vpow2.f32 %v2380_v48 }
 0x4b4   :  { %v4306_v49 = vpop.eup %4305 }
 0x4b5   :  { %v1289_v3 = vadd.f32 1.0, %v4306_v49  ;;  %v4308_v5 = vpop.eup %4307 }
 0x4b6   :  { %v1296_v6 = vadd.f32 1.0, %v4308_v5 }
 0x4b7   :  { %4309 = vrcp.f32 %v1289_v3 }
 0x4b8   :  { %4311 = vrcp.f32 %v1296_v6 }
 0x4c1   :  { %v4310_v11 = vpop.eup %4309 }
 0x4c2   :  { %v4312_v59 = vpop.eup %4311 }
 0x4c3   :  { %v1372_v60 = vsub.f32 1.0, %v4312_v59  ;;  %v1374_v37 = vmul.f32 %v4312_v59, %v4857_v38 }
 0x4c5   :  { %v1365_v52 = vpop.f32.mrb[18].mxu1 }
 0x4c6   :  { %v1366_v56 = vadd.f32 %v4718_v57, %v1365_v52  ;;  %v3253_v7 = vpop.f32.mrb[19].mxu1 }
 0x4c8   :  { %v1369_v13 = vmul.f32 %v4310_v11, %v1366_v56 }
 0x4ca   :  { %v1370_v17 = vadd.f32 %v4681_v10, %v1369_v13 }
 0x4cc   :  { %4313 = vtanh.f32 %v1370_v17 }
 0x4d6   :  { %v4314_v4 = vpop.eup %4313 }
 0x4d7   :  { %v1373_v51 = vmul.f32 %v4314_v4, %v1372_v60 }
 0x4d9   :  { %v4925_v12 = vadd.f32 %v1374_v37, %v1373_v51 }
 0x4db   :  { %2381 = vst [vmem:[%s5161_s4 + $0x18] sm:$0xff] %v4925_v12  ;;  %3287 = vmatmul.mubr.f32.vlgmr.msra.gmra.mrb[28].mxu0 %v4925_v12  ;;  %3322 = vmatmul.mubr.f32.vlgmr.msra.gmra.mrb[20].mxu1 %v4925_v12 }
 0x4dc   :  { %4028 = vmatpush3.bf16.msra.mxu0 %v4594_v36  ;;  %3356 = vmatprep.mubr.msk.f32.mxu0 %vm4386_vm9, %v4384_v1 }
 0x4dd   :  { %4029 = vmatprep.subr.bf16.mxu0 %v5164_v28  ;;  %4052 = vmatpush3.bf16.msra.mxu1 %v4489_v35 }
 0x4de   :  { %4053 = vmatprep.subr.bf16.mxu1 %v5164_v28  ;;  %3391 = vmatprep.mubr.msk.f32.mxu1 %vm4386_vm9, %v4384_v1 }
 0x4e0   :  { %4031 = vmatpush3.bf16.msra.mxu0 %v4603_v39 }
 0x4e1   :  { %4032 = vmatprep.subr.bf16.mxu0 %v5164_v28  ;;  %4055 = vmatpush3.bf16.msra.mxu1 %v4498_v43 }
 0x4e2   :  { %4056 = vmatprep.subr.bf16.mxu1 %v5164_v28 }
 0x4e4   :  { %4034 = vmatpush3.bf16.msra.mxu0 %v4611_v42 }
 0x4e5   :  { %4035 = vmatprep.subr.bf16.mxu0 %v5164_v28  ;;  %4058 = vmatpush3.bf16.msra.mxu1 %v4514_v54 }
 0x4e6   :  { %4059 = vmatprep.subr.bf16.mxu1 %v5164_v28 }
 0x4e8   :  { %4037 = vmatpush3.bf16.msra.mxu0 %v4619_v47 }
 0x4e9   :  { %4038 = vmatprep.subr.bf16.mxu0 %v5164_v28  ;;  %4061 = vmatpush3.bf16.msra.mxu1 %v4529_v63 }
 0x4ea   :  { %4062 = vmatprep.subr.bf16.mxu1 %v5164_v28 }
 0x4ec   :  { %4040 = vmatpush3.bf16.msra.mxu0 %v4625_v50 }
 0x4ed   :  { %4041 = vmatprep.subr.bf16.mxu0 %v5164_v28  ;;  %4064 = vmatpush3.bf16.msra.mxu1 %v4547_v8 }
 0x4ee   :  { %4065 = vmatprep.subr.bf16.mxu1 %v5164_v28 }
 0x4f0   :  { %4043 = vmatpush3.bf16.msra.mxu0 %v4631_v53 }
 0x4f1   :  { %4044 = vmatprep.subr.bf16.mxu0 %v5164_v28  ;;  %4067 = vmatpush3.bf16.msra.mxu1 %v4560_v15 }
 0x4f2   :  { %4068 = vmatprep.subr.bf16.mxu1 %v5164_v28 }
 0x4f4   :  { %4046 = vmatpush3.bf16.msra.mxu0 %v4637_v58 }
 0x4f5   :  { %4047 = vmatprep.subr.bf16.mxu0 %v5164_v28  ;;  %4070 = vmatpush3.bf16.msra.mxu1 %v4572_v21 }
 0x4f6   :  { %4071 = vmatprep.subr.bf16.mxu1 %v5164_v28 }
 0x4f8   :  { %4049 = vmatpush3.bf16.msra.mxu0 %v4643_v61 }
 0x4f9   :  { %4074 = vmatprep.subr.bf16.mxu0 %v5164_v28  ;;  %4073 = vmatpush3.bf16.msra.mxu1 %v4582_v27 }
 0x4fa   :  { %4098 = vmatprep.subr.bf16.mxu1 %v5164_v28 }
 0x4fb   :  { %3357 = vmatmul.mubr.f32.vlgmr.msra.gmra.mrb[30].mxu0 %v4925_v12 }
 0x4fc   :  { %4076 = vmatpush3.bf16.msra.mxu0 %v4500_v44  ;;  %3426 = vmatprep.mubr.msk.f32.mxu0 %vm4386_vm9, %v4384_v1 }
 0x4fd   :  { %4077 = vmatprep.subr.bf16.mxu0 %v5164_v28 }
 0x500   :  { %4079 = vmatpush3.bf16.msra.mxu0 %v4516_v55 }
 0x501   :  { %4080 = vmatprep.subr.bf16.mxu0 %v5164_v28 }
 0x504   :  { %4082 = vmatpush3.bf16.msra.mxu0 %v4531_v0 }
 0x505   :  { %4083 = vmatprep.subr.bf16.mxu0 %v5164_v28 }
 0x508   :  { %4085 = vmatpush3.bf16.msra.mxu0 %v4549_v9 }
 0x509   :  { %4086 = vmatprep.subr.bf16.mxu0 %v5164_v28 }
 0x50c   :  { %4088 = vmatpush3.bf16.msra.mxu0 %v4562_v16 }
 0x50d   :  { %4089 = vmatprep.subr.bf16.mxu0 %v5164_v28 }
 0x510   :  { %4091 = vmatpush3.bf16.msra.mxu0 %v4574_v22 }
 0x511   :  { %4092 = vmatprep.subr.bf16.mxu0 %v5164_v28 }
 0x514   :  { %4094 = vmatpush3.bf16.msra.mxu0 %v4584_v29 }
 0x515   :  { %4095 = vmatprep.subr.bf16.mxu0 %v5164_v28 }
 0x518   :  { %4097 = vmatpush3.bf16.msra.mxu0 %v4592_v34 }
 0x519   :  { %4122 = vmatprep.subr.bf16.mxu0 %v5164_v28 }
 0x5ae   :  { %v1450_v10 = vpop.f32.mrb[28].mxu0  ;;  %v1520_v38 = vpop.f32.mrb[20].mxu1 }
 0x5af   :  { %v1524_v62 = vadd.f32 %v1450_v10, %v4695_v19  ;;  %v1531_v2 = vadd.f32 %v1520_v38, %v4699_v23  ;;  %v3288_v40 = vpop.f32.mrb[29].mxu0  ;;  %v3323_v41 = vpop.f32.mrb[21].mxu1 }
 0x5b1   :  { %v2382_v45 = vmul.f32 -1.442695, %v1524_v62  ;;  %v2383_v46 = vmul.f32 -1.442695, %v1531_v2 }
 0x5b3   :  { %4315 = vpow2.f32 %v2382_v45 }
 0x5b4   :  { %4317 = vpow2.f32 %v2383_v46 }
 0x5bd   :  { %v4316_v48 = vpop.eup %4315 }
 0x5be   :  { %v1528_v49 = vadd.f32 1.0, %v4316_v48  ;;  %v4318_v3 = vpop.eup %4317 }
 0x5bf   :  { %v1535_v5 = vadd.f32 1.0, %v4318_v3 }
 0x5c0   :  { %4319 = vrcp.f32 %v1528_v49 }
 0x5c1   :  { %4321 = vrcp.f32 %v1535_v5 }
 0x5ca   :  { %v4320_v7 = vpop.eup %4319 }
 0x5cb   :  { %v4322_v11 = vpop.eup %4321 }
 0x5cc   :  { %v1611_v13 = vsub.f32 1.0, %v4322_v11  ;;  %v1613_v60 = vmul.f32 %v4322_v11, %v4925_v12 }
 0x5ce   :  { %v1604_v6 = vpop.f32.mrb[30].mxu0 }
 0x5cf   :  { %v1605_v52 = vadd.f32 %v4718_v57, %v1604_v6  ;;  %v3358_v56 = vpop.f32.mrb[31].mxu0 }
 0x5d1   :  { %v1608_v19 = vmul.f32 %v4320_v7, %v1605_v52 }
 0x5d3   :  { %v1609_v23 = vadd.f32 %v1608_v19, %v4693_v18 }
 0x5d5   :  { %4323 = vtanh.f32 %v1609_v23 }
 0x5df   :  { %v4324_v17 = vpop.eup %4323 }
 0x5e0   :  { %v1612_v59 = vmul.f32 %v4324_v17, %v1611_v13 }
 0x5e2   :  { %v4993_v4 = vadd.f32 %v1613_v60, %v1612_v59 }
 0x5e4   :  { %2384 = vst [vmem:[%s5161_s4 + $0x20] sm:$0xff] %v4993_v4  ;;  %3392 = vmatmul.mubr.f32.vlgmr.msra.gmra.mrb[22].mxu1 %v4993_v4  ;;  %3427 = vmatmul.mubr.f32.vlgmr.msra.gmra.mrb[32].mxu0 %v4993_v4 }
 0x5e5   :  { %4100 = vmatpush3.bf16.msra.mxu1 %v4594_v36  ;;  %3461 = vmatprep.mubr.msk.f32.mxu1 %vm4386_vm9, %v4384_v1 }
 0x5e6   :  { %4101 = vmatprep.subr.bf16.mxu1 %v5164_v28  ;;  %4124 = vmatpush3.bf16.msra.mxu0 %v4489_v35 }
 0x5e7   :  { %4125 = vmatprep.subr.bf16.mxu0 %v5164_v28  ;;  %3496 = vmatprep.mubr.msk.f32.mxu0 %vm4386_vm9, %v4384_v1 }
 0x5e9   :  { %4103 = vmatpush3.bf16.msra.mxu1 %v4603_v39 }
 0x5ea   :  { %4104 = vmatprep.subr.bf16.mxu1 %v5164_v28  ;;  %4127 = vmatpush3.bf16.msra.mxu0 %v4498_v43 }
 0x5eb   :  { %4128 = vmatprep.subr.bf16.mxu0 %v5164_v28 }
 0x5ed   :  { %4106 = vmatpush3.bf16.msra.mxu1 %v4611_v42 }
 0x5ee   :  { %4107 = vmatprep.subr.bf16.mxu1 %v5164_v28  ;;  %4130 = vmatpush3.bf16.msra.mxu0 %v4514_v54 }
 0x5ef   :  { %4131 = vmatprep.subr.bf16.mxu0 %v5164_v28 }
 0x5f1   :  { %4109 = vmatpush3.bf16.msra.mxu1 %v4619_v47 }
 0x5f2   :  { %4110 = vmatprep.subr.bf16.mxu1 %v5164_v28  ;;  %4133 = vmatpush3.bf16.msra.mxu0 %v4529_v63 }
 0x5f3   :  { %4134 = vmatprep.subr.bf16.mxu0 %v5164_v28 }
 0x5f5   :  { %4112 = vmatpush3.bf16.msra.mxu1 %v4625_v50 }
 0x5f6   :  { %4113 = vmatprep.subr.bf16.mxu1 %v5164_v28  ;;  %4136 = vmatpush3.bf16.msra.mxu0 %v4547_v8 }
 0x5f7   :  { %4137 = vmatprep.subr.bf16.mxu0 %v5164_v28 }
 0x5f9   :  { %4115 = vmatpush3.bf16.msra.mxu1 %v4631_v53 }
 0x5fa   :  { %4116 = vmatprep.subr.bf16.mxu1 %v5164_v28  ;;  %4139 = vmatpush3.bf16.msra.mxu0 %v4560_v15 }
 0x5fb   :  { %4140 = vmatprep.subr.bf16.mxu0 %v5164_v28 }
 0x5fd   :  { %4118 = vmatpush3.bf16.msra.mxu1 %v4637_v58 }
 0x5fe   :  { %4119 = vmatprep.subr.bf16.mxu1 %v5164_v28  ;;  %4142 = vmatpush3.bf16.msra.mxu0 %v4572_v21 }
 0x5ff   :  { %4143 = vmatprep.subr.bf16.mxu0 %v5164_v28 }
 0x601   :  { %4121 = vmatpush3.bf16.msra.mxu1 %v4643_v61 }
 0x602   :  { %4146 = vmatprep.subr.bf16.mxu1 %v5164_v28  ;;  %4145 = vmatpush3.bf16.msra.mxu0 %v4582_v27 }
 0x603   :  { %4170 = vmatprep.subr.bf16.mxu0 %v5164_v28 }
 0x604   :  { %3462 = vmatmul.mubr.f32.vlgmr.msra.gmra.mrb[24].mxu1 %v4993_v4 }
 0x605   :  { %4148 = vmatpush3.bf16.msra.mxu1 %v4500_v44  ;;  %3531 = vmatprep.mubr.msk.f32.mxu1 %vm4386_vm9, %v4384_v1 }
 0x606   :  { %4149 = vmatprep.subr.bf16.mxu1 %v5164_v28 }
 0x609   :  { %4151 = vmatpush3.bf16.msra.mxu1 %v4516_v55 }
 0x60a   :  { %4152 = vmatprep.subr.bf16.mxu1 %v5164_v28 }
 0x60d   :  { %4154 = vmatpush3.bf16.msra.mxu1 %v4531_v0 }
 0x60e   :  { %4155 = vmatprep.subr.bf16.mxu1 %v5164_v28 }
 0x611   :  { %4157 = vmatpush3.bf16.msra.mxu1 %v4549_v9 }
 0x612   :  { %4158 = vmatprep.subr.bf16.mxu1 %v5164_v28 }
 0x615   :  { %4160 = vmatpush3.bf16.msra.mxu1 %v4562_v16 }
 0x616   :  { %4161 = vmatprep.subr.bf16.mxu1 %v5164_v28 }
 0x619   :  { %4163 = vmatpush3.bf16.msra.mxu1 %v4574_v22 }
 0x61a   :  { %4164 = vmatprep.subr.bf16.mxu1 %v5164_v28 }
 0x61d   :  { %4166 = vmatpush3.bf16.msra.mxu1 %v4584_v29 }
 0x61e   :  { %4167 = vmatprep.subr.bf16.mxu1 %v5164_v28 }
 0x621   :  { %4169 = vmatpush3.bf16.msra.mxu1 %v4592_v34 }
 0x622   :  { %4194 = vmatprep.subr.bf16.mxu1 %v5164_v28 }
 0x6b7   :  { %v1689_v18 = vpop.f32.mrb[22].mxu1  ;;  %v1759_v51 = vpop.f32.mrb[32].mxu0 }
 0x6b8   :  { %v1763_v37 = vadd.f32 %v1689_v18, %v4703_v25  ;;  %v1770_v12 = vadd.f32 %v1759_v51, %v4705_v26  ;;  %v3393_v10 = vpop.f32.mrb[23].mxu1  ;;  %v3428_v38 = vpop.f32.mrb[33].mxu0 }
 0x6ba   :  { %v2385_v62 = vmul.f32 -1.442695, %v1763_v37  ;;  %v2386_v2 = vmul.f32 -1.442695, %v1770_v12 }
 0x6bc   :  { %4325 = vpow2.f32 %v2385_v62 }
 0x6bd   :  { %4327 = vpow2.f32 %v2386_v2 }
 0x6c6   :  { %v4326_v40 = vpop.eup %4325 }
 0x6c7   :  { %v1767_v41 = vadd.f32 1.0, %v4326_v40  ;;  %v4328_v45 = vpop.eup %4327 }
 0x6c8   :  { %v1774_v46 = vadd.f32 1.0, %v4328_v45 }
 0x6c9   :  { %4329 = vrcp.f32 %v1767_v41 }
 0x6ca   :  { %4331 = vrcp.f32 %v1774_v46 }
 0x6d3   :  { %v4330_v5 = vpop.eup %4329 }
 0x6d4   :  { %v4332_v6 = vpop.eup %4331 }
 0x6d5   :  { %v1850_v52 = vsub.f32 1.0, %v4332_v6  ;;  %v1852_v19 = vmul.f32 %v4332_v6, %v4993_v4 }
 0x6d7   :  { %v1843_v48 = vpop.f32.mrb[24].mxu1 }
 0x6d8   :  { %v1844_v49 = vadd.f32 %v4718_v57, %v1843_v48  ;;  %v3463_v3 = vpop.f32.mrb[25].mxu1 }
 0x6da   :  { %v1847_v25 = vmul.f32 %v4330_v5, %v1844_v49 }
 0x6dc   :  { %v1848_v26 = vadd.f32 %v4689_v14, %v1847_v25 }
 0x6de   :  { %4333 = vtanh.f32 %v1848_v26 }
 0x6e8   :  { %v4334_v56 = vpop.eup %4333 }
 0x6e9   :  { %v1851_v7 = vmul.f32 %v4334_v56, %v1850_v52 }
 0x6eb   :  { %v5061_v23 = vadd.f32 %v1852_v19, %v1851_v7 }
 0x6ed   :  { %2387 = vst [vmem:[%s5161_s4 + $0x28] sm:$0xff] %v5061_v23  ;;  %3497 = vmatmul.mubr.f32.vlgmr.msra.gmra.mrb[34].mxu0 %v5061_v23  ;;  %3532 = vmatmul.mubr.f32.vlgmr.msra.gmra.mrb[26].mxu1 %v5061_v23 }
 0x6ee   :  { %4172 = vmatpush3.bf16.msra.mxu0 %v4594_v36  ;;  %3566 = vmatprep.mubr.msk.f32.mxu0 %vm4386_vm9, %v4384_v1 }
 0x6ef   :  { %4173 = vmatprep.subr.bf16.mxu0 %v5164_v28  ;;  %4196 = vmatpush3.bf16.msra.mxu1 %v4489_v35 }
 0x6f0   :  { %4197 = vmatprep.subr.bf16.mxu1 %v5164_v28  ;;  %3601 = vmatprep.mubr.msk.f32.mxu1 %vm4386_vm9, %v4384_v1 }
 0x6f2   :  { %4175 = vmatpush3.bf16.msra.mxu0 %v4603_v39 }
 0x6f3   :  { %4176 = vmatprep.subr.bf16.mxu0 %v5164_v28  ;;  %4199 = vmatpush3.bf16.msra.mxu1 %v4498_v43 }
 0x6f4   :  { %4200 = vmatprep.subr.bf16.mxu1 %v5164_v28 }
 0x6f6   :  { %4178 = vmatpush3.bf16.msra.mxu0 %v4611_v42 }
 0x6f7   :  { %4179 = vmatprep.subr.bf16.mxu0 %v5164_v28  ;;  %4202 = vmatpush3.bf16.msra.mxu1 %v4514_v54 }
 0x6f8   :  { %4203 = vmatprep.subr.bf16.mxu1 %v5164_v28 }
 0x6fa   :  { %4181 = vmatpush3.bf16.msra.mxu0 %v4619_v47 }
 0x6fb   :  { %4182 = vmatprep.subr.bf16.mxu0 %v5164_v28  ;;  %4205 = vmatpush3.bf16.msra.mxu1 %v4529_v63 }
 0x6fc   :  { %4206 = vmatprep.subr.bf16.mxu1 %v5164_v28 }
 0x6fe   :  { %4184 = vmatpush3.bf16.msra.mxu0 %v4625_v50 }
 0x6ff   :  { %4185 = vmatprep.subr.bf16.mxu0 %v5164_v28  ;;  %4208 = vmatpush3.bf16.msra.mxu1 %v4547_v8 }
 0x700   :  { %4209 = vmatprep.subr.bf16.mxu1 %v5164_v28 }
 0x702   :  { %4187 = vmatpush3.bf16.msra.mxu0 %v4631_v53 }
 0x703   :  { %4188 = vmatprep.subr.bf16.mxu0 %v5164_v28  ;;  %4211 = vmatpush3.bf16.msra.mxu1 %v4560_v15 }
 0x704   :  { %4212 = vmatprep.subr.bf16.mxu1 %v5164_v28 }
 0x706   :  { %4190 = vmatpush3.bf16.msra.mxu0 %v4637_v58 }
 0x707   :  { %4191 = vmatprep.subr.bf16.mxu0 %v5164_v28  ;;  %4214 = vmatpush3.bf16.msra.mxu1 %v4572_v21 }
 0x708   :  { %4215 = vmatprep.subr.bf16.mxu1 %v5164_v28 }
 0x70a   :  { %4193 = vmatpush3.bf16.msra.mxu0 %v4643_v61 }
 0x70b   :  { %4218 = vmatprep.subr.bf16.mxu0 %v5164_v28  ;;  %4217 = vmatpush3.bf16.msra.mxu1 %v4582_v27 }
 0x70c   :  { %4242 = vmatprep.subr.bf16.mxu1 %v5164_v28 }
 0x70d   :  { %3567 = vmatmul.mubr.f32.vlgmr.msra.gmra.mrb[36].mxu0 %v5061_v23 }
 0x70e   :  { %4220 = vmatpush3.bf16.msra.mxu0 %v4500_v44  ;;  %3636 = vmatprep.mubr.msk.f32.mxu0 %vm4386_vm9, %v4384_v1 }
 0x70f   :  { %4221 = vmatprep.subr.bf16.mxu0 %v5164_v28 }
 0x712   :  { %4223 = vmatpush3.bf16.msra.mxu0 %v4516_v55 }
 0x713   :  { %4224 = vmatprep.subr.bf16.mxu0 %v5164_v28 }
 0x716   :  { %4226 = vmatpush3.bf16.msra.mxu0 %v4531_v0 }
 0x717   :  { %4227 = vmatprep.subr.bf16.mxu0 %v5164_v28 }
 0x71a   :  { %4229 = vmatpush3.bf16.msra.mxu0 %v4549_v9 }
 0x71b   :  { %4230 = vmatprep.subr.bf16.mxu0 %v5164_v28 }
 0x71e   :  { %4232 = vmatpush3.bf16.msra.mxu0 %v4562_v16 }
 0x71f   :  { %4233 = vmatprep.subr.bf16.mxu0 %v5164_v28 }
 0x722   :  { %4235 = vmatpush3.bf16.msra.mxu0 %v4574_v22 }
 0x723   :  { %4236 = vmatprep.subr.bf16.mxu0 %v5164_v28 }
 0x726   :  { %4238 = vmatpush3.bf16.msra.mxu0 %v4584_v29 }
 0x727   :  { %4239 = vmatprep.subr.bf16.mxu0 %v5164_v28 }
 0x72a   :  { %4241 = vmatpush3.bf16.msra.mxu0 %v4592_v34 }
 0x7c0   :  { %v1928_v35 = vpop.f32.mrb[34].mxu0  ;;  %v1998_v43 = vpop.f32.mrb[26].mxu1 }
 0x7c1   :  { %v2002_v44 = vadd.f32 %v1928_v35, %v4707_v30  ;;  %v2009_v54 = vadd.f32 %v1998_v43, %v4709_v31  ;;  %v3498_v55 = vpop.f32.mrb[35].mxu0  ;;  %v3533_v63 = vpop.f32.mrb[27].mxu1 }
 0x7c3   :  { %v2388_v0 = vmul.f32 -1.442695, %v2002_v44  ;;  %v2389_v8 = vmul.f32 -1.442695, %v2009_v54 }
 0x7c5   :  { %4335 = vpow2.f32 %v2388_v0 }
 0x7c6   :  { %4337 = vpow2.f32 %v2389_v8 }
 0x7cf   :  { %v4336_v9 = vpop.eup %4335 }
 0x7d0   :  { %v2006_v15 = vadd.f32 1.0, %v4336_v9  ;;  %v4338_v16 = vpop.eup %4337 }
 0x7d1   :  { %v2013_v21 = vadd.f32 1.0, %v4338_v16 }
 0x7d2   :  { %4339 = vrcp.f32 %v2006_v15 }
 0x7d3   :  { %4341 = vrcp.f32 %v2013_v21 }
 0x7dc   :  { %v4340_v34 = vpop.eup %4339 }
 0x7dd   :  { %v4342_v31 = vpop.eup %4341 }
 0x7de   :  { %v2089_v11 = vsub.f32 1.0, %v4342_v31  ;;  %v2091_v59 = vmul.f32 %v4342_v31, %v5061_v23 }
 0x7e0   :  { %v2082_v22 = vpop.f32.mrb[36].mxu0 }
 0x7e1   :  { %v2083_v27 = vadd.f32 %v4718_v57, %v2082_v22  ;;  %v3568_v29 = vpop.f32.mrb[37].mxu0 }
 0x7e3   :  { %v2086_v14 = vmul.f32 %v4340_v34, %v2083_v27 }
 0x7e5   :  { %v2087_v30 = vadd.f32 %v2086_v14, %v4701_v24 }
 0x7e7   :  { %4343 = vtanh.f32 %v2087_v30 }
 0x7f1   :  { %v4344_v13 = vpop.eup %4343 }
 0x7f2   :  { %v2090_v17 = vmul.f32 %v4344_v13, %v2089_v11 }
 0x7f4   :  { %v2092_v60 = vadd.f32 %v2091_v59, %v2090_v17 }
 0x7f6   :  { %2390 = vst [vmem:[%s5161_s4 + $0x30] sm:$0xff] %v2092_v60  ;;  %3602 = vmatmul.mubr.f32.vlgmr.msra.gmra.mrb[28].mxu1 %v2092_v60  ;;  %3637 = vmatmul.mubr.f32.vlgmr.msra.gmra.mrb[38].mxu0 %v2092_v60 }
 0x7f7   :  { %4244 = vmatpush3.bf16.msra.mxu1 %v4594_v36  ;;  %3671 = vmatprep.mubr.msk.f32.mxu1 %vm4386_vm9, %v4384_v1 }
 0x7f8   :  { %4245 = vmatprep.subr.bf16.mxu1 %v5164_v28 }
 0x7fb   :  { %4247 = vmatpush3.bf16.msra.mxu1 %v4603_v39 }
 0x7fc   :  { %4248 = vmatprep.subr.bf16.mxu1 %v5164_v28 }
 0x7ff   :  { %4250 = vmatpush3.bf16.msra.mxu1 %v4611_v42 }
 0x800   :  { %4251 = vmatprep.subr.bf16.mxu1 %v5164_v28 }
 0x803   :  { %4253 = vmatpush3.bf16.msra.mxu1 %v4619_v47 }
 0x804   :  { %4254 = vmatprep.subr.bf16.mxu1 %v5164_v28 }
 0x807   :  { %4256 = vmatpush3.bf16.msra.mxu1 %v4625_v50 }
 0x808   :  { %4257 = vmatprep.subr.bf16.mxu1 %v5164_v28 }
 0x80b   :  { %4259 = vmatpush3.bf16.msra.mxu1 %v4631_v53 }
 0x80c   :  { %4260 = vmatprep.subr.bf16.mxu1 %v5164_v28 }
 0x80f   :  { %4262 = vmatpush3.bf16.msra.mxu1 %v4637_v58 }
 0x810   :  { %4263 = vmatprep.subr.bf16.mxu1 %v5164_v28 }
 0x813   :  { %4265 = vmatpush3.bf16.msra.mxu1 %v4643_v61  ;;  %v4355_v61 = vld [vmem:[%s5160_s3] ss:$0 sm:$0xff] }
 0x816   :  { %3672 = vmatmul.mubr.f32.vlgmr.msra.gmra.mrb[30].mxu1 %v2092_v60 }
 0x8c9   :  { %v2167_v1 = vpop.f32.mrb[28].mxu1  ;;  %v2237_v36 = vpop.f32.mrb[38].mxu0 }
 0x8ca   :  { %v2241_v39 = vadd.f32 %v2167_v1, %v4711_v32  ;;  %v2248_v42 = vadd.f32 %v2237_v36, %v4713_v33  ;;  %v3603_v47 = vpop.f32.mrb[29].mxu1  ;;  %v3638_v50 = vpop.f32.mrb[39].mxu0 }
 0x8cc   :  { %v2391_v24 = vmul.f32 -1.442695, %v2241_v39  ;;  %v2392_v53 = vmul.f32 -1.442695, %v2248_v42 }
 0x8ce   :  { %4345 = vpow2.f32 %v2391_v24 }
 0x8cf   :  { %4347 = vpow2.f32 %v2392_v53 }
 0x8d8   :  { %v4346_v57 = vpop.eup %4345 }
 0x8d9   :  { %v2245_v4 = vadd.f32 1.0, %v4346_v57  ;;  %v4348_v58 = vpop.eup %4347 }
 0x8da   :  { %v2252_v28 = vadd.f32 1.0, %v4348_v58 }
 0x8db   :  { %4349 = vrcp.f32 %v2245_v4 }
 0x8dc   :  { %4351 = vrcp.f32 %v2252_v28 }
 0x8e5   :  { %v4350_v37 = vpop.eup %4349 }
 0x8e6   :  { %v4352_v10 = vpop.eup %4351 }
 0x8e7   :  { %v2328_v38 = vsub.f32 1.0, %v4352_v10  ;;  %v2330_v2 = vmul.f32 %v4352_v10, %v2092_v60 }
 0x8e9   :  { %v2321_v18 = vpop.f32.mrb[30].mxu1 }
 0x8ea   :  { %v2322_v51 = vadd.f32 %v4355_v61, %v2321_v18  ;;  %v3673_v32 = vpop.f32.mrb[31].mxu1 }
 0x8ec   :  { %v2325_v33 = vmul.f32 %v4350_v37, %v2322_v51 }
 0x8ee   :  { %v2326_v12 = vadd.f32 %v4697_v20, %v2325_v33 }
 0x8f0   :  { %4353 = vtanh.f32 %v2326_v12 }
 0x8fa   :  { %v4354_v62 = vpop.eup %4353 }
 0x8fb   :  { %v2329_v40 = vmul.f32 %v4354_v62, %v2328_v38 }
 0x8fd   :  { %v2331_v41 = vadd.f32 %v2330_v2, %v2329_v40 }
 0x8ff   :  { %2393 = vst [vmem:[%s5161_s4 + $0x38] sm:$0xff] %v2331_v41 }
 0x900   :  { %2338 = vsyncpa [#allocation4], 1 }

</bundles_post_ra>
